<compile_context>
chip_gen: v5e
topology: v5e:2x2
jax: 0.10.0
libtpu: 0.0.40
codegen_flags: <defaults>
</compile_context>

<pallas_src>
import functools
import math

import jax
import jax.numpy as jnp
from jax.experimental import pallas as pl
from jax.experimental.pallas import tpu as pltpu


def _round_up(x, m):
    return (x + m - 1) // m * m


def _choose_q_tile(lq):
    """Query tile: <= 128 (v5e/v7x friendly), multiple of 8; Lq is padded to it."""
    if lq <= 128:
        return _round_up(lq, 8)
    return 128


def _choose_heads_per_block(n_heads, head_dim, lk, tq, attn_itemsize):
    """Heads processed per grid step.

    Split the head axis only if the per-group lane width (H_sub * head_dim) stays
    a multiple of 128 (BlockSpec constraint on the sliced weight blocks); aim for
    an attention out-block of <= ~8 MiB so it double-buffers inside v7x VMEM.
    """
    target = 8 * 2 ** 20
    best = n_heads
    for hs in range(n_heads, 0, -1):
        if n_heads % hs:
            continue
        if hs != n_heads and (hs * head_dim) % 128 != 0:
            continue
        best = hs
        if hs * tq * lk * attn_itemsize <= target:
            break
    return best


def _vmem_limit_bytes(tq, lk, d, hg_d, hs, num_hg, head_dim,
                      compute_itemsize, attn_itemsize, return_attention):
    lane = lambda n: _round_up(max(int(n), 1), 128)
    sub = lambda n: _round_up(max(int(n), 1), 8)
    f32 = 4
    b = 0
    # double-buffered pipeline blocks
    b += 2 * sub(tq) * lane(d) * compute_itemsize            # q tile
    b += 2 * 2 * sub(lk) * lane(d) * compute_itemsize        # k, v
    b += 2 * 3 * sub(d) * lane(hg_d) * compute_itemsize      # wq, wk, wv column slices
    b += 2 * sub(hg_d) * lane(d) * compute_itemsize          # wo row slice
    b += 2 * (3 * lane(hg_d) + lane(d)) * 8 * f32            # biases (f32)
    b += 2 * sub(tq) * lane(d) * f32                         # x out block
    if return_attention:
        b += 2 * hs * sub(tq) * lane(lk) * attn_itemsize     # attention out block
    # single-buffered scratch (projected K/V, head-split; minor dim lane-padded)
    b += 2 * num_hg * hs * sub(lk) * lane(head_dim) * compute_itemsize
    return int(min(max(2 * b, 32 * 2 ** 20), 64 * 2 ** 20))


def _mha_kernel(q_ref, k_ref, v_ref,
                wq_ref, bq_ref, wk_ref, bk_ref, wv_ref, bv_ref, wo_ref, bo_ref,
                *rest,
                heads_per_block, head_dim, inv_scale, compute_dtype,
                return_attention):
    if return_attention:
        out_ref, attn_ref, k_scr, v_scr = rest
    else:
        out_ref, k_scr, v_scr = rest
        attn_ref = None

    cd = compute_dtype
    f32 = jnp.float32
    hs, hd = heads_per_block, head_dim
    qi = pl.program_id(1)
    hg = pl.program_id(2)

    # ---- K/V projection + head split for this head group: once per batch ------
    # Hoisted out of the query-tile axis; scratch persists across qi steps.
    @pl.when(qi == 0)
    def _project_kv():
        kp = jnp.dot(k_ref[0], wk_ref[...], preferred_element_type=f32) + bk_ref[...]
        vp = jnp.dot(v_ref[0], wv_ref[...], preferred_element_type=f32) + bv_ref[...]
        lk = kp.shape[0]
        # (Lk, hs*hd) -> (hs, Lk, hd); layout chosen by Mosaic (no per-head
        # masked scratch stores every grid step).
        k_scr[hg] = jnp.swapaxes(kp.reshape(lk, hs, hd), 0, 1).astype(cd)
        v_scr[hg] = jnp.swapaxes(vp.reshape(lk, hs, hd), 0, 1).astype(cd)

    # ---- Q projection for this (query tile, head group) -----------------------
    qp = jnp.dot(q_ref[0], wq_ref[...], preferred_element_type=f32) + bq_ref[...]
    tq = qp.shape[0]
    qh = jnp.swapaxes(qp.reshape(tq, hs, hd), 0, 1).astype(cd)      # (hs, TQ, hd)

    kh = k_scr[hg]                                                  # (hs, Lk, hd)
    vh = v_scr[hg]

    # ---- scaled dot-product attention (softmax kept in f32) -------------------
    energy = jnp.einsum("hqd,hkd->hqk", qh, kh,
                        preferred_element_type=f32) * inv_scale
    m = jnp.max(energy, axis=-1, keepdims=True)
    p = jnp.exp(energy - m)
    denom = jnp.sum(p, axis=-1, keepdims=True)
    # Exact reciprocal so returned attention rows sum to 1.
    attn = p * pl.reciprocal(denom, approx=False)

    if attn_ref is not None:
        attn_ref[0] = attn.astype(attn_ref.dtype)

    # TODO(synk): dropout is identity (eval mode); mask=None path only.
    ctx = jnp.einsum("hqk,hkd->hqd", attn.astype(cd), vh,
                     preferred_element_type=f32)                    # (hs, TQ, hd)
    ctx2 = jnp.swapaxes(ctx, 0, 1).reshape(tq, hs * hd).astype(cd)  # (TQ, hs*hd)

    # fc_o partial product for this head group; accumulated into the resident
    # output block across the (innermost) head-group axis.
    part = jnp.dot(ctx2, wo_ref[...], preferred_element_type=f32)   # (TQ, D)

    @pl.when(hg == 0)
    def _init_out():
        out_ref[0] = (part + bo_ref[...]).astype(out_ref.dtype)

    @pl.when(hg != 0)
    def _acc_out():
        out_ref[0] = out_ref[0] + part.astype(out_ref.dtype)


def multi_head_attention(query, key, value, params, *, n_heads,
                         compute_dtype=jnp.float32,
                         attn_dtype=jnp.float32,
                         return_attention=True):
    """query/key/value: (B, L, D).  params: dict of (in,out) weights + (1,out) biases.

    compute_dtype=jnp.bfloat16 runs all matmuls on the MXU in bf16 (f32 accumulation,
    f32 softmax); weights/activations are pre-cast in the wrapper so HBM traffic and
    resident VMEM are halved.  attn_dtype controls the attention-probability output
    dtype; return_attention=False skips that writeback entirely.
    """
    B, Lq, D = query.shape
    Lk = key.shape[1]
    assert D % n_heads == 0
    head_dim = D // n_heads
    inv_scale = 1.0 / math.sqrt(float(head_dim))

    cd = jnp.dtype(compute_dtype)
    f32 = jnp.float32

    TQ = _choose_q_tile(Lq)
    Lq_pad = _round_up(Lq, TQ)
    num_q_tiles = Lq_pad // TQ

    HS = _choose_heads_per_block(n_heads, head_dim, Lk, TQ,
                                 jnp.dtype(attn_dtype).itemsize)
    num_hg = n_heads // HS
    HG_D = HS * head_dim

    # Pre-cast activations/weights to the MXU compute dtype (biases stay f32).
    def cst(x):
        return x if x.dtype == cd else x.astype(cd)

    q_in, k_in, v_in = cst(query), cst(key), cst(value)
    if Lq_pad != Lq:
        q_in = jnp.pad(q_in, ((0, 0), (0, Lq_pad - Lq), (0, 0)))

    wq, wk, wv, wo = (cst(params[n]) for n in ("wq", "wk", "wv", "wo"))
    bq, bk, bv, bo = (params[n].astype(f32) for n in ("bq", "bk", "bv", "bo"))

    kernel = functools.partial(
        _mha_kernel,
        heads_per_block=HS, head_dim=head_dim, inv_scale=inv_scale,
        compute_dtype=cd, return_attention=return_attention)

    # fc_q/fc_k/fc_v weights are column-sliced per head group, fc_o row-sliced.
    w_in_spec = pl.BlockSpec((D, HG_D), lambda b, qi, hg: (0, hg))
    b_in_spec = pl.BlockSpec((1, HG_D), lambda b, qi, hg: (0, hg))
    wo_spec = pl.BlockSpec((HG_D, D), lambda b, qi, hg: (hg, 0))
    bo_spec = pl.BlockSpec((1, D), lambda b, qi, hg: (0, 0))

    in_specs = [
        pl.BlockSpec((1, TQ, D), lambda b, qi, hg: (b, qi, 0)),   # query tile
        pl.BlockSpec((1, Lk, D), lambda b, qi, hg: (b, 0, 0)),    # key (per batch)
        pl.BlockSpec((1, Lk, D), lambda b, qi, hg: (b, 0, 0)),    # value (per batch)
        w_in_spec, b_in_spec,                                     # fc_q
        w_in_spec, b_in_spec,                                     # fc_k
        w_in_spec, b_in_spec,                                     # fc_v
        wo_spec, bo_spec,                                         # fc_o
    ]

    out_shape = [jax.ShapeDtypeStruct((B, Lq_pad, D), f32)]
    out_specs = [pl.BlockSpec((1, TQ, D), lambda b, qi, hg: (b, qi, 0))]
    if return_attention:
        out_shape.append(
            jax.ShapeDtypeStruct((B, n_heads, Lq_pad, Lk), attn_dtype))
        out_specs.append(
            pl.BlockSpec((1, HS, TQ, Lk), lambda b, qi, hg: (b, hg, qi, 0)))

    scratch_shapes = [
        pltpu.VMEM((num_hg, HS, Lk, head_dim), cd),   # projected K, head-split
        pltpu.VMEM((num_hg, HS, Lk, head_dim), cd),   # projected V, head-split
    ]

    vmem_limit = _vmem_limit_bytes(TQ, Lk, D, HG_D, HS, num_hg, head_dim,
                                   cd.itemsize, jnp.dtype(attn_dtype).itemsize,
                                   return_attention)

    flops = 2 * B * D * D * (2 * Lq_pad + 2 * Lk) + 4 * B * Lq_pad * Lk * D
    transcendentals = B * n_heads * Lq_pad * Lk
    bytes_accessed = (cd.itemsize * (B * Lq_pad * D + 2 * B * Lk * D + 4 * D * D)
                      + 4 * (4 * D + B * Lq_pad * D))
    if return_attention:
        bytes_accessed += jnp.dtype(attn_dtype).itemsize * B * n_heads * Lq_pad * Lk
    cost = pl.CostEstimate(flops=int(flops), transcendentals=int(transcendentals),
                           bytes_accessed=int(bytes_accessed))

    grid_spec = pltpu.PrefetchScalarGridSpec(
        num_scalar_prefetch=0,
        grid=(B, num_q_tiles, num_hg),
        in_specs=in_specs,
        out_specs=out_specs,
        scratch_shapes=scratch_shapes,
    )

    fn = pl.pallas_call(
        kernel,
        out_shape=tuple(out_shape),
        grid_spec=grid_spec,
        compiler_params=pltpu.CompilerParams(
            # Batch axis feeds both v7x TensorCores; qi/hg carry VMEM state
            # (K/V scratch across qi, fc_o accumulation across hg) so they must
            # stay "arbitrary".
            dimension_semantics=("parallel", "arbitrary", "arbitrary"),
            vmem_limit_bytes=vmem_limit),
        cost_estimate=cost,
    )
    results = fn(q_in, k_in, v_in, wq, bq, wk, bk, wv, bv, wo, bo)

    if return_attention:
        x_pad, attn_pad = results
    else:
        (x_pad,) = results
        attn_pad = None

    x = x_pad[:, :Lq] if Lq_pad != Lq else x_pad
    attn = None
    if attn_pad is not None:
        attn = attn_pad[:, :, :Lq, :] if Lq_pad != Lq else attn_pad
    return x, attn


def _reference(query, key, value, params, *, n_heads):
    """Pure-JAX reference mirroring the PyTorch forward (eval mode)."""
    B, Lq, D = query.shape
    Hd = D // n_heads
    scale = math.sqrt(float(Hd))

    def lin(x, w, b):
        return x @ w + b

    Q = lin(query, params["wq"], params["bq"])
    K = lin(key, params["wk"], params["bk"])
    V = lin(value, params["wv"], params["bv"])

    def split(x):
        B_, L_, _ = x.shape
        return x.reshape(B_, L_, n_heads, Hd).transpose(0, 2, 1, 3)

    Qh, Kh, Vh = split(Q), split(K), split(V)
    energy = jnp.einsum("bhqd,bhkd->bhqk", Qh, Kh) / scale
    attn = jax.nn.softmax(energy, axis=-1)
    x = jnp.einsum("bhqk,bhkd->bhqd", attn, Vh)
    x = x.transpose(0, 2, 1, 3).reshape(B, Lq, D)
    x = lin(x, params["wo"], params["bo"])
    return x, attn


if __name__ == "__main__":
    # Small deterministic config: batch=2, seq=8, hid_dim=32, n_heads=4 -> head_dim=8.
    B, L, D, H = 2, 8, 32, 4

    key0 = jax.random.PRNGKey(0)
    keys = jax.random.split(key0, 11)

    query = jax.random.normal(keys[0], (B, L, D), dtype=jnp.float32)
    key_in = jax.random.normal(keys[1], (B, L, D), dtype=jnp.float32)
    value = jax.random.normal(keys[2], (B, L, D), dtype=jnp.float32)

    def make_linear(wk_, bk_):
        # nn.Linear(D, D): weight stored transposed (in, out), bias as (1, out).
        w = jax.random.normal(wk_, (D, D), dtype=jnp.float32) * (1.0 / math.sqrt(D))
        b = jax.random.normal(bk_, (1, D), dtype=jnp.float32) * 0.02
        return w, b

    wq, bq = make_linear(keys[3], keys[4])
    wk, bk = make_linear(keys[5], keys[6])
    wv, bv = make_linear(keys[7], keys[8])
    wo, bo = make_linear(keys[9], keys[10])
    params = dict(wq=wq, bq=bq, wk=wk, bk=bk, wv=wv, bv=bv, wo=wo, bo=bo)

    x_exp, attn_exp = _reference(query, key_in, value, params, n_heads=H)

    # f32 MXU path (default).
    x_out, attn_out = multi_head_attention(query, key_in, value, params, n_heads=H)
    jax.block_until_ready((x_out, attn_out))
    assert x_out.shape == (B, L, D)
    assert attn_out.shape == (B, H, L, L)
    assert jnp.allclose(x_out, x_exp, atol=5e-3, rtol=5e-3)
    assert jnp.allclose(attn_out, attn_exp, atol=5e-3, rtol=5e-3)

    # bf16 MXU path (v5e/v6e/v7x throughput): bf16 weights/activations pre-cast in
    # the wrapper, f32 accumulation + f32 softmax, bf16 attention writeback.
    x_bf, attn_bf = multi_head_attention(query, key_in, value, params, n_heads=H,
                                         compute_dtype=jnp.bfloat16,
                                         attn_dtype=jnp.bfloat16)
    jax.block_until_ready((x_bf, attn_bf))
    assert jnp.allclose(x_bf, x_exp, atol=1e-1, rtol=1e-1)
    assert jnp.allclose(attn_bf.astype(jnp.float32), attn_exp, atol=3e-2, rtol=3e-2)

    # Attention-probability writeback skipped entirely (output-projection only).
    x_noattn, attn_none = multi_head_attention(query, key_in, value, params,
                                               n_heads=H, return_attention=False)
    jax.block_until_ready(x_noattn)
    assert attn_none is None
    assert jnp.allclose(x_noattn, x_exp, atol=5e-3, rtol=5e-3)

    print("KERNEL_OK")
</pallas_src>

<mosaic_0001>
module attributes {stable_mosaic.version = 11 : i64} {
  func.func @_mha_kernel(%arg0: i32, %arg1: i32, %arg2: i32, %arg3: memref<1x8x32xf32, #tpu.memory_space<vmem>>, %arg4: memref<1x8x32xf32, #tpu.memory_space<vmem>>, %arg5: memref<1x8x32xf32, #tpu.memory_space<vmem>>, %arg6: memref<32x32xf32, #tpu.memory_space<vmem>>, %arg7: memref<1x32xf32, #tpu.memory_space<vmem>>, %arg8: memref<32x32xf32, #tpu.memory_space<vmem>>, %arg9: memref<1x32xf32, #tpu.memory_space<vmem>>, %arg10: memref<32x32xf32, #tpu.memory_space<vmem>>, %arg11: memref<1x32xf32, #tpu.memory_space<vmem>>, %arg12: memref<32x32xf32, #tpu.memory_space<vmem>>, %arg13: memref<1x32xf32, #tpu.memory_space<vmem>>, %arg14: memref<1x8x32xf32, #tpu.memory_space<vmem>>, %arg15: memref<1x4x8x8xf32, #tpu.memory_space<vmem>>, %arg16: memref<1x4x8x8xf32, #tpu.memory_space<vmem>>, %arg17: memref<1x4x8x8xf32, #tpu.memory_space<vmem>>) attributes {dimension_semantics = [#tpu.dimension_semantics<parallel>, #tpu.dimension_semantics<arbitrary>, #tpu.dimension_semantics<arbitrary>], iteration_bounds = array<i64: 2, 1, 1>, scalar_prefetch = 0 : i64, scratch_operands = 2 : i64, tpu.core_type = #tpu.core_type<tc>, window_params = [{transform_indices = @transform_0, window_bounds = array<i64: 1, 8, 32>}, {transform_indices = @transform_1, window_bounds = array<i64: 1, 8, 32>}, {transform_indices = @transform_2, window_bounds = array<i64: 1, 8, 32>}, {transform_indices = @transform_3, window_bounds = array<i64: 32, 32>}, {transform_indices = @transform_4, window_bounds = array<i64: 1, 32>}, {transform_indices = @transform_5, window_bounds = array<i64: 32, 32>}, {transform_indices = @transform_6, window_bounds = array<i64: 1, 32>}, {transform_indices = @transform_7, window_bounds = array<i64: 32, 32>}, {transform_indices = @transform_8, window_bounds = array<i64: 1, 32>}, {transform_indices = @transform_9, window_bounds = array<i64: 32, 32>}, {pipeline_mode = #tpu.pipeline_mode<synchronous>, transform_indices = @transform_10, window_bounds = array<i64: 1, 32>}, {transform_indices = @transform_11, window_bounds = array<i64: 1, 8, 32>}, {transform_indices = @transform_12, window_bounds = array<i64: 1, 4, 8, 8>}]} {
    %c0_i32 = arith.constant 0 : i32
    %0 = arith.cmpi eq, %arg1, %c0_i32 : i32
    %1 = arith.extui %0 : i1 to i32
    %c0_i32_0 = arith.constant 0 : i32
    %2 = arith.cmpi ne, %1, %c0_i32_0 : i32
    scf.if %2 {
      %c0_29 = arith.constant 0 : index
      %c0_30 = arith.constant 0 : index
      %c0_31 = arith.constant 0 : index
      %45 = vector.load %arg4[%c0_29, %c0_30, %c0_31] : memref<1x8x32xf32, #tpu.memory_space<vmem>>, vector<1x8x32xf32>
      %46 = vector.shape_cast %45 : vector<1x8x32xf32> to vector<8x32xf32>
      %c0_32 = arith.constant 0 : index
      %c0_33 = arith.constant 0 : index
      %47 = vector.load %arg8[%c0_32, %c0_33] : memref<32x32xf32, #tpu.memory_space<vmem>>, vector<32x32xf32>
      %cst_34 = arith.constant dense<0.000000e+00> : vector<8x32xf32>
      %48 = tpu.matmul %46, %47, %cst_34 {dimension_numbers = #tpu.dot_dimension_numbers<[1], [0], [0], [1], [0, 0, 1, 1], [], []>} : vector<8x32xf32>, vector<32x32xf32>, vector<8x32xf32> -> vector<8x32xf32>
      %c0_35 = arith.constant 0 : index
      %c0_36 = arith.constant 0 : index
      %49 = vector.load %arg9[%c0_35, %c0_36] : memref<1x32xf32, #tpu.memory_space<vmem>>, vector<1x32xf32>
      %50 = vector.broadcast %49 : vector<1x32xf32> to vector<8x32xf32>
      %51 = arith.addf %48, %50 : vector<8x32xf32>
      %c0_37 = arith.constant 0 : index
      %c0_38 = arith.constant 0 : index
      %c0_39 = arith.constant 0 : index
      %52 = vector.load %arg5[%c0_37, %c0_38, %c0_39] : memref<1x8x32xf32, #tpu.memory_space<vmem>>, vector<1x8x32xf32>
      %53 = vector.shape_cast %52 : vector<1x8x32xf32> to vector<8x32xf32>
      %c0_40 = arith.constant 0 : index
      %c0_41 = arith.constant 0 : index
      %54 = vector.load %arg10[%c0_40, %c0_41] : memref<32x32xf32, #tpu.memory_space<vmem>>, vector<32x32xf32>
      %cst_42 = arith.constant dense<0.000000e+00> : vector<8x32xf32>
      %55 = tpu.matmul %53, %54, %cst_42 {dimension_numbers = #tpu.dot_dimension_numbers<[1], [0], [0], [1], [0, 0, 1, 1], [], []>} : vector<8x32xf32>, vector<32x32xf32>, vector<8x32xf32> -> vector<8x32xf32>
      %c0_43 = arith.constant 0 : index
      %c0_44 = arith.constant 0 : index
      %56 = vector.load %arg11[%c0_43, %c0_44] : memref<1x32xf32, #tpu.memory_space<vmem>>, vector<1x32xf32>
      %57 = vector.broadcast %56 : vector<1x32xf32> to vector<8x32xf32>
      %58 = arith.addf %55, %57 : vector<8x32xf32>
      %59 = vector.shape_cast %51 : vector<8x32xf32> to vector<8x4x8xf32>
      %60 = tpu.transpose %59, [1, 0, 2] : vector<8x4x8xf32> -> vector<4x8x8xf32>
      %61 = arith.index_cast %arg2 : i32 to index
      %c0_45 = arith.constant 0 : index
      %c0_46 = arith.constant 0 : index
      %c0_47 = arith.constant 0 : index
      %62 = vector.load %arg16[%61, %c0_45, %c0_46, %c0_47] : memref<1x4x8x8xf32, #tpu.memory_space<vmem>>, vector<1x4x8x8xf32>
      %63 = vector.shape_cast %62 : vector<1x4x8x8xf32> to vector<4x8x8xf32>
      %64 = vector.shape_cast %60 : vector<4x8x8xf32> to vector<1x4x8x8xf32>
      tpu.vector_store %arg16[%61, %c0_45, %c0_46, %c0_47], %64 {strides = array<i32>} : memref<1x4x8x8xf32, #tpu.memory_space<vmem>>, vector<1x4x8x8xf32>,
      %65 = vector.shape_cast %58 : vector<8x32xf32> to vector<8x4x8xf32>
      %66 = tpu.transpose %65, [1, 0, 2] : vector<8x4x8xf32> -> vector<4x8x8xf32>
      %67 = arith.index_cast %arg2 : i32 to index
      %c0_48 = arith.constant 0 : index
      %c0_49 = arith.constant 0 : index
      %c0_50 = arith.constant 0 : index
      %68 = vector.load %arg17[%67, %c0_48, %c0_49, %c0_50] : memref<1x4x8x8xf32, #tpu.memory_space<vmem>>, vector<1x4x8x8xf32>
      %69 = vector.shape_cast %68 : vector<1x4x8x8xf32> to vector<4x8x8xf32>
      %70 = vector.shape_cast %66 : vector<4x8x8xf32> to vector<1x4x8x8xf32>
      tpu.vector_store %arg17[%67, %c0_48, %c0_49, %c0_50], %70 {strides = array<i32>} : memref<1x4x8x8xf32, #tpu.memory_space<vmem>>, vector<1x4x8x8xf32>,
    } else {
    }
    %c0 = arith.constant 0 : index
    %c0_1 = arith.constant 0 : index
    %c0_2 = arith.constant 0 : index
    %3 = vector.load %arg3[%c0, %c0_1, %c0_2] : memref<1x8x32xf32, #tpu.memory_space<vmem>>, vector<1x8x32xf32>
    %4 = vector.shape_cast %3 : vector<1x8x32xf32> to vector<8x32xf32>
    %c0_3 = arith.constant 0 : index
    %c0_4 = arith.constant 0 : index
    %5 = vector.load %arg6[%c0_3, %c0_4] : memref<32x32xf32, #tpu.memory_space<vmem>>, vector<32x32xf32>
    %cst = arith.constant dense<0.000000e+00> : vector<8x32xf32>
    %6 = tpu.matmul %4, %5, %cst {dimension_numbers = #tpu.dot_dimension_numbers<[1], [0], [0], [1], [0, 0, 1, 1], [], []>} : vector<8x32xf32>, vector<32x32xf32>, vector<8x32xf32> -> vector<8x32xf32>
    %c0_5 = arith.constant 0 : index
    %c0_6 = arith.constant 0 : index
    %7 = vector.load %arg7[%c0_5, %c0_6] : memref<1x32xf32, #tpu.memory_space<vmem>>, vector<1x32xf32>
    %8 = vector.broadcast %7 : vector<1x32xf32> to vector<8x32xf32>
    %9 = arith.addf %6, %8 : vector<8x32xf32>
    %10 = vector.shape_cast %9 : vector<8x32xf32> to vector<8x4x8xf32>
    %11 = tpu.transpose %10, [1, 0, 2] : vector<8x4x8xf32> -> vector<4x8x8xf32>
    %12 = arith.index_cast %arg2 : i32 to index
    %c0_7 = arith.constant 0 : index
    %c0_8 = arith.constant 0 : index
    %c0_9 = arith.constant 0 : index
    %13 = vector.load %arg16[%12, %c0_7, %c0_8, %c0_9] : memref<1x4x8x8xf32, #tpu.memory_space<vmem>>, vector<1x4x8x8xf32>
    %14 = vector.shape_cast %13 : vector<1x4x8x8xf32> to vector<4x8x8xf32>
    %15 = arith.index_cast %arg2 : i32 to index
    %c0_10 = arith.constant 0 : index
    %c0_11 = arith.constant 0 : index
    %c0_12 = arith.constant 0 : index
    %16 = vector.load %arg17[%15, %c0_10, %c0_11, %c0_12] : memref<1x4x8x8xf32, #tpu.memory_space<vmem>>, vector<1x4x8x8xf32>
    %17 = vector.shape_cast %16 : vector<1x4x8x8xf32> to vector<4x8x8xf32>
    "tpu.trace_start"() <{level = 10 : i32, message = "hqd,hkd->hqk"}> : () -> ()
    %cst_13 = arith.constant dense<0.000000e+00> : vector<4x8x8xf32>
    %18 = tpu.matmul %11, %14, %cst_13 {dimension_numbers = #tpu.dot_dimension_numbers<[2], [2], [1], [1], [0, 0, 0, 1, 1, 1], [0], [0]>} : vector<4x8x8xf32>, vector<4x8x8xf32>, vector<4x8x8xf32> -> vector<4x8x8xf32>
    "tpu.trace_stop"() : () -> ()
    %cst_14 = arith.constant 0.353553385 : f32
    %19 = vector.broadcast %cst_14 : f32 to vector<4x8x8xf32>
    %20 = arith.mulf %18, %19 : vector<4x8x8xf32>
    %cst_15 = arith.constant dense<0xFF800000> : vector<4x8xf32>
    %21 = vector.multi_reduction <maximumf>, %20, %cst_15 [2] : vector<4x8x8xf32> to vector<4x8xf32>
    %22 = vector.shape_cast %21 : vector<4x8xf32> to vector<4x8x1xf32>
    %23 = vector.broadcast %22 : vector<4x8x1xf32> to vector<4x8x8xf32>
    %24 = arith.subf %20, %23 : vector<4x8x8xf32>
    %25 = math.exp %24 : vector<4x8x8xf32>
    %cst_16 = arith.constant dense<0.000000e+00> : vector<4x8xf32>
    %26 = vector.multi_reduction <add>, %25, %cst_16 [2] : vector<4x8x8xf32> to vector<4x8xf32>
    %27 = vector.shape_cast %26 : vector<4x8xf32> to vector<4x8x1xf32>
    %28 = tpu.reciprocal %27 : vector<4x8x1xf32> -> vector<4x8x1xf32>
    %29 = vector.broadcast %28 : vector<4x8x1xf32> to vector<4x8x8xf32>
    %30 = arith.mulf %25, %29 : vector<4x8x8xf32>
    %c0_17 = arith.constant 0 : index
    %c0_18 = arith.constant 0 : index
    %c0_19 = arith.constant 0 : index
    %c0_20 = arith.constant 0 : index
    %31 = vector.load %arg15[%c0_17, %c0_18, %c0_19, %c0_20] : memref<1x4x8x8xf32, #tpu.memory_space<vmem>>, vector<1x4x8x8xf32>
    %32 = vector.shape_cast %31 : vector<1x4x8x8xf32> to vector<4x8x8xf32>
    %33 = vector.shape_cast %30 : vector<4x8x8xf32> to vector<1x4x8x8xf32>
    tpu.vector_store %arg15[%c0_17, %c0_18, %c0_19, %c0_20], %33 {strides = array<i32>} : memref<1x4x8x8xf32, #tpu.memory_space<vmem>>, vector<1x4x8x8xf32>,
    "tpu.trace_start"() <{level = 10 : i32, message = "hqk,hkd->hqd"}> : () -> ()
    %cst_21 = arith.constant dense<0.000000e+00> : vector<4x8x8xf32>
    %34 = tpu.matmul %30, %17, %cst_21 {dimension_numbers = #tpu.dot_dimension_numbers<[2], [1], [1], [2], [0, 0, 0, 1, 1, 2], [0], [0]>} : vector<4x8x8xf32>, vector<4x8x8xf32>, vector<4x8x8xf32> -> vector<4x8x8xf32>
    "tpu.trace_stop"() : () -> ()
    %35 = tpu.transpose %34, [1, 0, 2] : vector<4x8x8xf32> -> vector<8x4x8xf32>
    %36 = vector.shape_cast %35 : vector<8x4x8xf32> to vector<8x32xf32>
    %c0_22 = arith.constant 0 : index
    %c0_23 = arith.constant 0 : index
    %37 = vector.load %arg12[%c0_22, %c0_23] : memref<32x32xf32, #tpu.memory_space<vmem>>, vector<32x32xf32>
    %cst_24 = arith.constant dense<0.000000e+00> : vector<8x32xf32>
    %38 = tpu.matmul %36, %37, %cst_24 {dimension_numbers = #tpu.dot_dimension_numbers<[1], [0], [0], [1], [0, 0, 1, 1], [], []>} : vector<8x32xf32>, vector<32x32xf32>, vector<8x32xf32> -> vector<8x32xf32>
    %c0_i32_25 = arith.constant 0 : i32
    %39 = arith.cmpi eq, %arg2, %c0_i32_25 : i32
    %40 = arith.extui %39 : i1 to i32
    %c0_i32_26 = arith.constant 0 : i32
    %41 = arith.cmpi ne, %40, %c0_i32_26 : i32
    scf.if %41 {
      %c0_29 = arith.constant 0 : index
      %c0_30 = arith.constant 0 : index
      %45 = vector.load %arg13[%c0_29, %c0_30] : memref<1x32xf32, #tpu.memory_space<vmem>>, vector<1x32xf32>
      %46 = vector.broadcast %45 : vector<1x32xf32> to vector<8x32xf32>
      %47 = arith.addf %38, %46 : vector<8x32xf32>
      %c0_31 = arith.constant 0 : index
      %c0_32 = arith.constant 0 : index
      %c0_33 = arith.constant 0 : index
      %48 = vector.load %arg14[%c0_31, %c0_32, %c0_33] : memref<1x8x32xf32, #tpu.memory_space<vmem>>, vector<1x8x32xf32>
      %49 = vector.shape_cast %48 : vector<1x8x32xf32> to vector<8x32xf32>
      %50 = vector.shape_cast %47 : vector<8x32xf32> to vector<1x8x32xf32>
      tpu.vector_store %arg14[%c0_31, %c0_32, %c0_33], %50 {strides = array<i32>} : memref<1x8x32xf32, #tpu.memory_space<vmem>>, vector<1x8x32xf32>,
    } else {
    }
    %c0_i32_27 = arith.constant 0 : i32
    %42 = arith.cmpi ne, %arg2, %c0_i32_27 : i32
    %43 = arith.extui %42 : i1 to i32
    %c0_i32_28 = arith.constant 0 : i32
    %44 = arith.cmpi ne, %43, %c0_i32_28 : i32
    scf.if %44 {
      %c0_29 = arith.constant 0 : index
      %c0_30 = arith.constant 0 : index
      %c0_31 = arith.constant 0 : index
      %45 = vector.load %arg14[%c0_29, %c0_30, %c0_31] : memref<1x8x32xf32, #tpu.memory_space<vmem>>, vector<1x8x32xf32>
      %46 = vector.shape_cast %45 : vector<1x8x32xf32> to vector<8x32xf32>
      %47 = arith.addf %46, %38 : vector<8x32xf32>
      %c0_32 = arith.constant 0 : index
      %c0_33 = arith.constant 0 : index
      %c0_34 = arith.constant 0 : index
      %48 = vector.load %arg14[%c0_32, %c0_33, %c0_34] : memref<1x8x32xf32, #tpu.memory_space<vmem>>, vector<1x8x32xf32>
      %49 = vector.shape_cast %48 : vector<1x8x32xf32> to vector<8x32xf32>
      %50 = vector.shape_cast %47 : vector<8x32xf32> to vector<1x8x32xf32>
      tpu.vector_store %arg14[%c0_32, %c0_33, %c0_34], %50 {strides = array<i32>} : memref<1x8x32xf32, #tpu.memory_space<vmem>>, vector<1x8x32xf32>,
    } else {
    }
    return
  }
  func.func @transform_0(%arg0: i32, %arg1: i32, %arg2: i32) -> (i32, i32, i32) {
    %c0_i32 = arith.constant 0 : i32
    %c0_i32_0 = arith.constant 0 : i32
    return %arg0, %arg1, %c0_i32 : i32, i32, i32
  }
  func.func @transform_1(%arg0: i32, %arg1: i32, %arg2: i32) -> (i32, i32, i32) {
    %c0_i32 = arith.constant 0 : i32
    %c0_i32_0 = arith.constant 0 : i32
    %c0_i32_1 = arith.constant 0 : i32
    return %arg0, %c0_i32, %c0_i32_0 : i32, i32, i32
  }
  func.func @transform_2(%arg0: i32, %arg1: i32, %arg2: i32) -> (i32, i32, i32) {
    %c0_i32 = arith.constant 0 : i32
    %c0_i32_0 = arith.constant 0 : i32
    %c0_i32_1 = arith.constant 0 : i32
    return %arg0, %c0_i32, %c0_i32_0 : i32, i32, i32
  }
  func.func @transform_3(%arg0: i32, %arg1: i32, %arg2: i32) -> (i32, i32) {
    %c0_i32 = arith.constant 0 : i32
    %c0_i32_0 = arith.constant 0 : i32
    return %c0_i32, %arg2 : i32, i32
  }
  func.func @transform_4(%arg0: i32, %arg1: i32, %arg2: i32) -> (i32, i32) {
    %c0_i32 = arith.constant 0 : i32
    %c0_i32_0 = arith.constant 0 : i32
    return %c0_i32, %arg2 : i32, i32
  }
  func.func @transform_5(%arg0: i32, %arg1: i32, %arg2: i32) -> (i32, i32) {
    %c0_i32 = arith.constant 0 : i32
    %c0_i32_0 = arith.constant 0 : i32
    return %c0_i32, %arg2 : i32, i32
  }
  func.func @transform_6(%arg0: i32, %arg1: i32, %arg2: i32) -> (i32, i32) {
    %c0_i32 = arith.constant 0 : i32
    %c0_i32_0 = arith.constant 0 : i32
    return %c0_i32, %arg2 : i32, i32
  }
  func.func @transform_7(%arg0: i32, %arg1: i32, %arg2: i32) -> (i32, i32) {
    %c0_i32 = arith.constant 0 : i32
    %c0_i32_0 = arith.constant 0 : i32
    return %c0_i32, %arg2 : i32, i32
  }
  func.func @transform_8(%arg0: i32, %arg1: i32, %arg2: i32) -> (i32, i32) {
    %c0_i32 = arith.constant 0 : i32
    %c0_i32_0 = arith.constant 0 : i32
    return %c0_i32, %arg2 : i32, i32
  }
  func.func @transform_9(%arg0: i32, %arg1: i32, %arg2: i32) -> (i32, i32) {
    %c0_i32 = arith.constant 0 : i32
    %c0_i32_0 = arith.constant 0 : i32
    return %arg2, %c0_i32 : i32, i32
  }
  func.func @transform_10(%arg0: i32, %arg1: i32, %arg2: i32) -> (i32, i32) {
    %c0_i32 = arith.constant 0 : i32
    %c0_i32_0 = arith.constant 0 : i32
    %c0_i32_1 = arith.constant 0 : i32
    return %c0_i32, %c0_i32_0 : i32, i32
  }
  func.func @transform_11(%arg0: i32, %arg1: i32, %arg2: i32) -> (i32, i32, i32) {
    %c0_i32 = arith.constant 0 : i32
    %c0_i32_0 = arith.constant 0 : i32
    return %arg0, %arg1, %c0_i32 : i32, i32, i32
  }
  func.func @transform_12(%arg0: i32, %arg1: i32, %arg2: i32) -> (i32, i32, i32, i32) {
    %c0_i32 = arith.constant 0 : i32
    %c0_i32_0 = arith.constant 0 : i32
    return %arg0, %arg2, %arg1, %c0_i32 : i32, i32, i32, i32
  }
}

</mosaic_0001>

<bundles_post_ra>
// kernel: tpu_custom_call.1
= control target key start
LH: loop header
LB: loop body
LE: loop exit
PB: predicated region body
PF: predicated region fallthrough
CT: control target
= control target key end

     0   :  { %s3044_s0 = inlined_call_operand.hbm [shape: f32[2,8,32], index: 0, kind: input, shape index: {}]   ;;  %s3045_s1 = inlined_call_operand.hbm [shape: f32[2,8,32], index: 1, kind: input, shape index: {}]   ;;  %s3046_s2 = inlined_call_operand.hbm [shape: f32[2,8,32], index: 2, kind: input, shape index: {}]   ;;  %s3047_s3 = inlined_call_operand.hbm [shape: f32[32,32], index: 3, kind: input, shape index: {}]   ;;  %s3048_s4 = inlined_call_operand.vmem [shape: f32[1,32], index: 4, kind: input, shape index: {}]   ;;  %s3049_s5 = inlined_call_operand.hbm [shape: f32[32,32], index: 5, kind: input, shape index: {}]   ;;  %s3050_s6 = inlined_call_operand.vmem [shape: f32[1,32], index: 6, kind: input, shape index: {}]   ;;  %s3051_s7 = inlined_call_operand.hbm [shape: f32[32,32], index: 7, kind: input, shape index: {}]   ;;  %s3052_s8 = inlined_call_operand.vmem [shape: f32[1,32], index: 8, kind: input, shape index: {}]   ;;  %s3053_s9 = inlined_call_operand.hbm [shape: f32[32,32], index: 9, kind: input, shape index: {}]   ;;  %s3054_s10 = inlined_call_operand.vmem [shape: f32[1,32], index: 10, kind: input, shape index: {}]   ;;  %s3055_s11 = inlined_call_operand.hbm [shape: f32[2,8,32], index: 11, kind: output, shape index: {0}]   ;;  %s3056_s12 = inlined_call_operand.hbm [shape: f32[2,4,8,8], index: 12, kind: output, shape index: {1}]  }
   0x1   :  { %3070 = sst [smem:[#allocation31_spill]] %s3044_s0 }
   0x2   :  { %3071 = sst [smem:[#allocation32_spill]] %s3045_s1 }
   0x3   :  { %3072 = sst [smem:[#allocation33_spill]] %s3047_s3 }
   0x4   :  { %3073 = sst [smem:[#allocation34_spill]] %s3049_s5 }
   0x5   :  { %3074 = sst [smem:[#allocation35_spill]] %s3051_s7 }
   0x6   :  { %3075 = sst [smem:[#allocation36_spill]] %s3053_s9 }
   0x7   :  { %3076 = sst [smem:[#allocation37_spill]] %s3054_s10 }
   0x8   :  { %3077 = sst [smem:[#allocation38_spill]] %s3055_s11 }
   0x9   :  { %3078 = sst [smem:[#allocation39_spill]] %s3056_s12 }
   0xa   :  { %18 = vsyncpa [#allocation5], 0 }
   0xb   :  { %20 = vsyncpa [#allocation5 + $0x1], 0 }
   0xc   :  { %21 = vsyncpa [#allocation8], 0 }
   0xd   :  { %23 = vsyncpa [#allocation8 + $0x1], 0 }
   0xe   :  { %24 = vsyncpa [#allocation11], 0 }
   0xf   :  { %25 = vsyncpa [#allocation14], 0 }
  0x10   :  { %26 = vsyncpa [#allocation6], 0 }
  0x11   :  { %28 = vsyncpa [#allocation6 + $0x1], 0 }
  0x12   :  { %29 = vsyncpa [#allocation18], 0 }
  0x13   :  { %31 = vsyncpa [#allocation18 + $0x1], 0  ;;  %s2556_s21 = smov 0   ;;  %s2558_s22 = smov 0  }
  0x14   :  { %s2560_s23 = smov 0   ;;  %s2562_s24 = smov 0  }
  0x15   :  { %s2564_s25 = smov 0   ;;  %s2566_s26 = smov 0  }
  0x16 LB: > { %3079 = sst [smem:[#allocation25_spill]] %s2454_s21  ;;  %s2587_s27 = sadd.s32 4294967295, %s2474_s26   ;;  %s2474_s26 = sphi %s2566_s26, %s37_s26   ;;  %s2470_s25 = sphi %s2564_s25, %s3110_s25   ;;  %s2466_s24 = sphi %s2562_s24, %s3109_s24   ;;  %s2462_s23 = sphi %s2560_s23, %s3113_s23   ;;  %s2458_s22 = sphi %s2558_s22, %s3112_s22   ;;  %s2454_s21 = sphi %s2556_s21, %s3111_s21  }
  0x17   : > { %3080 = sst [smem:[#allocation26_spill]] %s2470_s25  ;;  %p1940_p0 = scmp.ge.s32.totalorder %s2474_s26, 1 }
  0x18   : > { %3081 = sst [smem:[#allocation27_spill]] %s2474_s26  ;;  %p79_p1 = scmp.eq.s32.totalorder %s2587_s27, 0 }
  0x19   : > { %p402_p2 = scmp.lt.s32.totalorder %s2474_s26, 3  ;;  %s3082_s3 = sld [smem:[#allocation33_spill]] }
  0x1a   : > { %s2476_s14 = smov [#allocation10]   ;;  %p1948_p6 = scmp.ge.s32.totalorder %s2474_s26, 2 }
  0x1b   : > { %p2595_p3 = pnand %p1940_p0, %p402_p2  ;;  %s417_s15 = sshll.u32 %s2476_s14, 4  ;;  %s418_s15 = int_to_ptr.vmem [resolvable:$true] %s417_s15 }
  0x1c   : > { %s3085_s7 = sld [smem:[#allocation35_spill]]  ;;  %s3057_s20 = smov 128  }
  0x1d   : > { %p2015_p4 = pneg %p2595_p3  ;;  %s3059_s28 = smov 8  }
  0x1e   : > { %s2479_s29 = smov [#allocation13]   ;;  %s1939_s17 = sadd.s32 4294967294, %s2474_s26  }
  0x1f   : > { %s415_s30 = sshll.u32 %s3082_s3, 4  ;;  %p2603_p5 = pnand %p2015_p4, %p79_p1  ;;  %s416_s30 = int_to_ptr.hbm [resolvable:$true] %s415_s30 }
  0x20   : > { %s461_s14 = sshll.u32 %s2479_s29, 4  ;;  %s56_s18 = sadd.s32 1, %s2470_s25  ;;  %s462_s14 = int_to_ptr.vmem [resolvable:$true] %s461_s14 }
  0x21   : > { %2018 = dma.hbm_to_vmem [thread:$0]  (!%p2603_p5), %s416_s30, 512, %s418_s15, [#allocation11], %s3057_s20, %s3057_s20, %s3059_s28  }
  0x22   : > { %s459_s19 = sshll.u32 %s3085_s7, 4  ;;  %p58_p7 = scmp.ge.s32.totalorder %s56_s18, 2  ;;  %s460_s19 = int_to_ptr.hbm [resolvable:$true] %s459_s19 }
  0x23   : > { %2024 = dma.hbm_to_vmem [thread:$0]  (!%p2603_p5), %s460_s19, 512, %s462_s14, [#allocation14], %s3057_s20, %s3057_s20, %s3059_s28  }
  0x24   : > { %s65_s3 = sadd.s32 1, %s2462_s23  ;;  %p72_p8 = scmp.ne.s32.totalorder %s2462_s23, %s2458_s22 }
  0x25   : > { %p73_p9 = scmp.eq.s32.totalorder %s2474_s26, 0  ;;  %s3115_s18 = smov (%p58_p7, %s56_s18), 0 }
  0x26   : > { %3086 = sst [smem:[#allocation28_spill]] %s3115_s18  ;;  %p78_p11 = scmp.ne.s32.totalorder %s2458_s22, %s2454_s21 }
  0x27   : > { %p2629_p10 = por %p73_p9, %p72_p8  ;;  %s60_s15 = ssub.s32 %s2470_s25, %s3115_s18 }
  0x28   : > { %p359_p12 = scmp.eq.s32.totalorder %s2587_s27, 1  ;;  %p63_p13 = scmp.eq.s32.totalorder %s60_s15, 0 }
  0x29   : > { %p2640_p0 = por %p79_p1, %p78_p11  ;;  %p365_p4 = scmp.eq.s32.totalorder %s1939_s17, 1 }
  0x2a   : > { %p2644_p2 = por %p359_p12, %p72_p8  ;;  %p2049_p9 = scmp.lt.s32.totalorder %s2474_s26, 2 }
  0x2b   : > { %s2649_s14 = scalar_select %p63_p13, %s2462_s23, %s65_s3  }
  0x2c   : > { %p2651_p7 = por %p365_p4, %p78_p11  ;;  %s3065_s28 = sand.u32 1, %s2462_s23  }
  0x2d   : > { %3090 = sst [smem:[#allocation29_spill]] %s2649_s14  ;;  %s2658_s7 = sshll.u32 %s2470_s25, 3 }
  0x2e   : > { %s3091_s20 = scalar_select %p2651_p7, 1, 0 }
  0x2f   : > { %s2662_s15 = sshll.u32 %s3065_s28, 3  ;;  %p2666_p8 = pnand %p2049_p9, %p2629_p10 }
  0x30   : > { %3092 = sst [smem:[#allocation30_spill]] %s3091_s20  ;;  %s521_s3 = sand.u32 1, %s2474_s26  }
  0x31   : > { %s3094_s1 = sld [smem:[#allocation32_spill]]  ;;  %s525_s21 = scalar_lea.vmem [#allocation7], %s2662_s15 }
  0x32   : > { %s533_s25 = sshll.u32 %s525_s21, 4  ;;  %s3095_s5 = sld [smem:[#allocation34_spill]]  ;;  %s534_s25 = int_to_ptr.vmem [resolvable:$true] %s533_s25 }
  0x33   : > { %s522_s12 = scalar_lea.sflag [#allocation8], %s521_s3  ;;  %s2480_s26 = smov [#allocation12]  }
  0x34   : > { %s439_s14 = sshll.u32 %s2480_s26, 4  ;;  %s3096_s9 = sld [smem:[#allocation36_spill]]  ;;  %s440_s14 = int_to_ptr.vmem [resolvable:$true] %s439_s14 }
  0x35   : > { %s3098_s28 = smov 128   ;;  %s2481_s3 = smov [#allocation15]  }
  0x36   : > { %s3099_s0 = sld [smem:[#allocation31_spill]]  ;;  %s505_s17 = scalar_lea.vmem [#allocation4], %s2662_s15 }
  0x37   : > { %s529_s20 = scalar_lea.hbm %s3094_s1, %s2658_s7 }
  0x38   : > { %s531_s10 = sshll.u32 %s529_s20, 4  ;;  %s437_s11 = sshll.u32 %s3095_s5, 4  ;;  %s532_s10 = int_to_ptr.hbm [resolvable:$true] %s531_s10  ;;  %s438_s11 = int_to_ptr.hbm [resolvable:$true] %s437_s11 }
  0x39   : > { %2034 = dma.hbm_to_vmem [thread:$0]  (!%p2666_p8), %s532_s10, 128, %s534_s25, %s522_s12  }
  0x3a   : > { %s482_s21 = sshll.u32 %s3096_s9, 4  ;;  %s3097_s20 = smov 8   ;;  %s483_s21 = int_to_ptr.hbm [resolvable:$true] %s482_s21 }
  0x3b   : > { %2021 = dma.hbm_to_vmem [thread:$0]  (!%p2603_p5), %s438_s11, 512, %s440_s14, [#allocation11], %s3098_s28, %s3098_s28, %s3097_s20  }
  0x3c   : > { %s484_s10 = sshll.u32 %s2481_s3, 4  ;;  %s510_s26 = scalar_lea.hbm %s3099_s0, %s2658_s7  ;;  %s485_s10 = int_to_ptr.vmem [resolvable:$true] %s484_s10 }
  0x3d   : > { %2027 = dma.hbm_to_vmem [thread:$0]  (!%p2603_p5), %s483_s21, 512, %s485_s10, [#allocation14], %s3098_s28, %s3098_s28, %s3097_s20  }
  0x3e   : > { %s512_s1 = sshll.u32 %s510_s26, 4  ;;  %s514_s5 = sshll.u32 %s505_s17, 4  ;;  %s513_s1 = int_to_ptr.hbm [resolvable:$true] %s512_s1  ;;  %s515_s5 = int_to_ptr.vmem [resolvable:$true] %s514_s5 }
  0x3f   : > { %s3100_s9 = sand.u32 1, %s2462_s23   ;;  %s548_s25 = scalar_lea.hbm %s3046_s2, %s2658_s7 }
  0x40   : > { %s502_s11 = scalar_lea.sflag [#allocation5], %s3100_s9  ;;  %s550_s30 = sshll.u32 %s548_s25, 4  ;;  %s551_s30 = int_to_ptr.hbm [resolvable:$true] %s550_s30 }
  0x41   : > { %2031 = dma.hbm_to_vmem [thread:$0]  (!%p2666_p8), %s513_s1, 128, %s515_s5, %s502_s11  }
  0x42   : > { %s544_s0 = scalar_lea.vmem [#allocation9], %s2662_s15  ;;  %561 = sbr.rel (%p2595_p3) target bundleno = 1190 (0x4a6), region = 64 }
  0x43   : > { %s552_s16 = sshll.u32 %s544_s0, 4  ;;  %s2713_s21 = sand.u32 (!%p2595_p3), 1, %s2458_s22   ;;  %s553_s16 = int_to_ptr.vmem [resolvable:$true] %s552_s16 }
  0x44   : > { %2037 = dma.hbm_to_vmem [thread:$0]  (!%p2666_p8), %s551_s30, 128, %s553_s16, %s522_s12  }
  0x45   : > { %s2716_s5 = sshll.u32 (!%p2595_p3), %s2713_s21, 3  ;;  %s564_s7 = scalar_lea.sflag (!%p2595_p3), [#allocation5], %s2713_s21 }
  0x46   : > { %s567_s9 = scalar_lea.vmem (!%p2595_p3), [#allocation4], %s2716_s5 }
  0x47   : > { %2429 = dma.done.wait (%p2640_p0), %s564_s7, 128  }
  0x48   : > { %2431 = vsyncadd (%p2640_p0), %s564_s7, 4294967168  ;;  %s573_s0 = sand.u32 1, %s2587_s27   ;;  %s577_s13 = scalar_lea.vmem [#allocation7], %s2716_s5 }
  0x49   : > { %s574_s12 = scalar_lea.sflag [#allocation8], %s573_s0 }
  0x4a   : > { %2433 = dma.done.wait (%p2640_p0), %s574_s12, 256  }
  0x4b   : > { %2435 = vsyncadd (%p2640_p0), %s574_s12, 4294967040  ;;  %s587_s18 = scalar_lea.vmem [#allocation9], %s2716_s5 }
  0x4c   : > { %2437 = dma.done.wait (%p79_p1), [#allocation11], 1024  }
  0x4d   : > { %2439 = vsyncadd (%p79_p1), [#allocation11], 4294966272 }
  0x4e   : > { %2441 = dma.done.wait (%p79_p1), [#allocation14], 1024  }
  0x4f   : > { %2443 = vsyncadd (%p79_p1), [#allocation14], 4294966272  ;;  %v692_v0 = vld [vmem:[#allocation12 + $0x18] sm:$0xff]  ;;  %v691_v2 = vld [vmem:[#allocation12 + $0x10] sm:$0xff]  ;;  %vm697_vm0 = vcmask 261120   ;;  %s2482_s15 = smov 104  }
  0x50   : > { %v1010_v1 = vld [vmem:[#allocation10 + $0x18] sm:$0xff]  ;;  %713 = vmatpush.msra.mxu0 %v692_v0  ;;  %v1009_v3 = vld [vmem:[#allocation10 + $0x10] sm:$0xff]  ;;  %v690_v4 = vld [vmem:[#allocation12 + $0x8] sm:$0xff]  ;;  %s2483_s20 = smov 120   ;;  %s2484_s26 = smov 112   ;;  %vm764_vm1 = vcmask 1047556  }
  0x51   : > { %1031 = vmatpush.msra.mxu2 %v1010_v1  ;;  %v1008_v5 = vld [vmem:[#allocation10 + $0x8] sm:$0xff]  ;;  %v689_v6 = vld [vmem:[#allocation12] sm:$0xff]  ;;  %v1006_v9 = vld [vmem:[%s567_s9] sm:$0xff]  ;;  %v2485_v17 = vmov 1983009808   ;;  %vm876_vm2 = vcmask 64512  }
  0x52   : > { %714 = vmatpush.msra.mxu0 %v691_v2  ;;  %v1007_v7 = vld [vmem:[#allocation10] sm:$0xff]  ;;  %v2118_v10 = vld [vmem:[%s3050_s6] ss:$0 sm:$0xff]  ;;  %v769_v18 = vunpack.c.l.s4 %v2485_v17  ;;  %v725_v26 = vld [vmem:[#allocation13 + $0x18] sm:$0xff]  ;;  %v2486_v32 = vmov 1934713408  }
  0x53   : > { %1032 = vmatpush.msra.mxu2 %v1009_v3  ;;  %v688_v8 = vld [vmem:[%s577_s13] sm:$0xff]  ;;  %v2119_v13 = vld [vmem:[%s3048_s4] ss:$0 sm:$0xff]  ;;  %745 = vmatpush.msra.mxu1 %v725_v26  ;;  %v793_v33 = vunpack.c.l.s4 %v2486_v32  ;;  %s1964_s11 = sshll.u32 %s2713_s21, 5  ;;  %s2487_s3 = smov 24  }
  0x54   : > { %715 = vmatpush.msra.mxu0 %v690_v4  ;;  %v2753_v25 = vunpack.c.0.s8 %v769_v18  ;;  %v724_v34 = vld [vmem:[#allocation13 + $0x10] sm:$0xff]  ;;  %v723_v37 = vld [vmem:[#allocation13 + $0x8] sm:$0xff]  ;;  %v722_v38 = vld [vmem:[#allocation13] sm:$0xff]  ;;  %s2924_s14 = scalar_lea.vmem [#allocation17], %s1964_s11  ;;  %s2488_s25 = smov 16  }
  0x55   : > { %1033 = vmatpush.msra.mxu2 %v1008_v5  ;;  %746 = vmatpush.msra.mxu1 %v724_v34  ;;  %v721_v43 = vld [vmem:[%s587_s18] sm:$0xff]  ;;  %v2765_v44 = vunpack.c.0.s8 %v793_v33  ;;  %s2489_s30 = smov 8   ;;  %s1988_s16 = sshll.u32 %s2466_s24, 5 }
  0x56   : > { %716 = vmatpush.msra.mxu0 %v689_v6  ;;  %s3101_s0 = sld [smem:[#allocation39_spill]]  ;;  %s1679_s13 = sshll.u32 %s2924_s14, 4  ;;  %s1680_s13 = int_to_ptr.vmem [resolvable:$true] %s1679_s13 }
  0x57   : > { %1034 = vmatpush.msra.mxu2 %v1007_v7  ;;  %1965 = vmatmul.msk.f32.vlgmr.msra.gmra.mxu0 %vm697_vm0, %v688_v8  ;;  %s1649_s27 = scalar_lea.sflag [#allocation18], %s2713_s21 }
  0x58   : > { %1967 = vmatmul.msk.f32.vlgmr.msra.gmra.mxu2 %vm697_vm0, %v1006_v9  ;;  %747 = vmatpush.msra.mxu1 %v723_v37 }
  0x5a   : > { %748 = vmatpush.msra.mxu1 %v722_v38 }
  0x5b   : > { %1966 = vmatmul.msk.f32.vlgmr.msra.gmra.mxu1 %vm697_vm0, %v721_v43 }
  0x5c   : > { %s1678_s12 = scalar_lea.hbm %s3101_s0, %s1988_s16  ;;  %s2368_s10 = scalar_lea.hbm %s3101_s0, 64 }
  0x5d   : > { %s1681_s18 = sshll.u32 %s1678_s12, 4  ;;  %s1682_s18 = int_to_ptr.hbm [resolvable:$true] %s1681_s18 }
  0x5e   : > { %s2362_s19 = sshra.s32 %s1682_s18, 4  ;;  %s2363_s19 = int_to_ptr.hbm [resolvable:$true] %s2362_s19 }
  0x5f   : > { %p2369_p10 = scmp.lt.s32.totalorder %s2363_s19, %s3101_s0 }
  0xd4   : > { %v718_v11 = vpop.f32.mrf.mxu0 }
  0xd5   : > { %v719_v12 = vadd.f32 %v2118_v10, %v718_v11 }
  0xd7   : > { %760 = vrot.lane.b32.xlu1 %v719_v12, %s2482_s15  ;;  %754 = vrot.lane.b32.xlu0 %v719_v12, %s2483_s20  ;;  %v766_v42 = vrot.slane %v719_v12, 4 }
  0xdb   : > { %v1036_v14 = vpop.f32.mrf.mxu2 }
  0xdc   : > { %v1037_v15 = vadd.f32 %v2119_v13, %v1036_v14 }
  0xde   : > { %1043 = vrot.lane.b32.xlu2 %v1037_v15, %s2484_s26  ;;  %v1052_v22 = vrot.slane %v1037_v15, 4 }
  0xdf   : > { %1040 = vrot.lane.b32.xlu1 %v1037_v15, %s2483_s20  ;;  %757 = vrot.lane.b32.xlu0 %v719_v12, %s2484_s26 }
  0xe6   : > { %1046 = vrot.lane.b32.xlu2 %v1037_v15, %s2482_s15 }
 0x138   : > { %v1044_v16 = vpop.permute.xlu2 %1043 }
 0x139   : > { %v1049_v19 = vrot.slane %v1044_v16, 4  ;;  %v1053_v28 = vsel %vm764_vm1, %v1044_v16, %v1052_v22 }
 0x13a   : > { %v1061_v36 = vperm.slane %v1053_v28, %v2753_v25 }
 0x13b   : > { %v1051_v27 = vsel %vm764_vm1, %v1049_v19, %v1037_v15 }
 0x13c   : > { %v1057_v35 = vperm.slane %v1051_v27, %v2753_v25  ;;  %v1088_v52 = vrot.slane %v1061_v36, 4 }
 0x13e   : > { %v1076_v51 = vrot.slane %v1057_v35, 4 }
 0x140   : > { %v1047_v29 = vpop.permute.xlu2 %1046 }
 0x141   : > { %v1062_v39 = vrot.slane %v1047_v29, 4 }
 0x149   : > { %v761_v20 = vpop.permute.xlu1 %760  ;;  %v755_v21 = vpop.permute.xlu0 %754 }
 0x14a   : > { %v776_v23 = vrot.slane %v761_v20, 4  ;;  %v778_v24 = vrot.slane %v755_v21, 4 }
 0x14c   : > { %v777_v30 = vsel %vm764_vm1, %v776_v23, %v755_v21  ;;  %v779_v31 = vsel %vm764_vm1, %v761_v20, %v778_v24 }
 0x14d   : > { %v783_v40 = vperm.slane %v777_v30, %v2753_v25  ;;  %v787_v41 = vperm.slane %v779_v31, %v2753_v25 }
 0x14f   : > { %v788_v55 = vrot.slane %v783_v40, 4  ;;  %v800_v56 = vrot.slane %v787_v41, 4 }
 0x151   : > { %v1041_v45 = vpop.permute.xlu1 %1040  ;;  %v758_v46 = vpop.permute.xlu0 %757 }
 0x152   : > { %v1063_v47 = vsel %vm764_vm1, %v1062_v39, %v1041_v45  ;;  %v1064_v48 = vrot.slane %v1041_v45, 4  ;;  %v763_v49 = vrot.slane %v758_v46, 4  ;;  %v767_v50 = vsel %vm764_vm1, %v758_v46, %v766_v42 }
 0x153   : > { %v1069_v53 = vperm.slane %v1063_v47, %v2753_v25  ;;  %v775_v54 = vperm.slane %v767_v50, %v2753_v25 }
 0x154   : > { %v1065_v57 = vsel %vm764_vm1, %v1047_v29, %v1064_v48  ;;  %v765_v58 = vsel %vm764_vm1, %v763_v49, %v719_v12 }
 0x155   : > { %v1073_v59 = vperm.slane %v1065_v57, %v2753_v25  ;;  %v1074_v60 = vrot.slane %v1069_v53, 4  ;;  %v1077_v61 = vsel %vm764_vm1, %v1069_v53, %v1076_v51  ;;  %v771_v62 = vperm.slane %v765_v58, %v2753_v25 }
 0x156   : > { %v1085_v63 = vperm.slane %v1077_v61, %v2765_v44  ;;  %v801_v0 = vsel %vm764_vm1, %v800_v56, %v775_v54  ;;  %v802_v1 = vrot.slane %v775_v54, 4 }
 0x157   : > { %v1075_v2 = vsel %vm764_vm1, %v1074_v60, %v1057_v35  ;;  %v1086_v3 = vrot.slane %v1073_v59, 4  ;;  %v1089_v4 = vsel %vm764_vm1, %v1073_v59, %v1088_v52  ;;  %v789_v5 = vsel %vm764_vm1, %v788_v55, %v771_v62 }
 0x158   : > { %v1081_v6 = vperm.slane %v1075_v2, %v2765_v44  ;;  %v1097_v7 = vperm.slane %v1089_v4, %v2765_v44  ;;  %v1100_v8 = vrot.slane %v1085_v63, 4  ;;  %v790_v9 = vrot.slane %v771_v62, 4 }
 0x159   : > { %v1087_v10 = vsel %vm764_vm1, %v1086_v3, %v1061_v36  ;;  %v803_v11 = vsel %vm764_vm1, %v787_v41, %v802_v1  ;;  %v807_v14 = vperm.slane %v801_v0, %v2765_v44  ;;  %v795_v16 = vperm.slane %v789_v5, %v2765_v44 }
 0x15a   : > { %v1093_v12 = vperm.slane %v1087_v10, %v2765_v44  ;;  %v1104_v13 = vrot.slane %v1097_v7, 4  ;;  %v791_v15 = vsel %vm764_vm1, %v783_v40, %v790_v9  ;;  %v811_v17 = vperm.slane %v803_v11, %v2765_v44 }
 0x15b   : > { %v1098_v18 = vrot.slane %v1081_v6, 4  ;;  %v1101_v19 = vsel %vm764_vm1, 0.0, %v1100_v8  ;;  %v799_v22 = vperm.slane %v791_v15, %v2765_v44  ;;  %v1106_v23 = vsel %vm764_vm1, %v1100_v8, %v1081_v6 }
 0x15c   : > { %v1102_v20 = vrot.slane %v1093_v12, 4  ;;  %v1105_v21 = vsel %vm764_vm1, 0.0, %v1104_v13  ;;  %v816_v26 = vrot.slane %v807_v14, 4  ;;  %v818_v27 = vrot.slane %v811_v17, 4 }
 0x15d   : > { %v1122_v24 = vrot.slane %v1105_v21, 4  ;;  %v1111_v28 = vrot.slane %v1101_v19, 4  ;;  %v812_v29 = vrot.slane %v795_v16, 4  ;;  %v814_v30 = vrot.slane %v799_v22, 4 }
 0x15e   : > { %v1103_v31 = vsel %vm764_vm1, 0.0, %v1102_v20  ;;  %v1099_v32 = vsel %vm764_vm1, 0.0, %v1098_v18  ;;  %v1117_v33 = vsel %vm764_vm1, %v1104_v13, %v1093_v12  ;;  %v819_v34 = vsel %vm764_vm1, 0.0, %v818_v27 }
 0x15f   : > { %v831_v35 = vsel %vm764_vm1, %v818_v27, %v807_v14  ;;  %v815_v36 = vsel %vm764_vm1, 0.0, %v814_v30  ;;  %v820_v37 = vsel %vm764_vm1, %v814_v30, %v795_v16  ;;  %v836_v39 = vrot.slane %v819_v34, 4 }
 0x160   : > { %v835_v38 = vperm.slane %v831_v35, %v2753_v25  ;;  %v817_v40 = vsel %vm764_vm1, 0.0, %v816_v26  ;;  %v824_v41 = vperm.slane %v820_v37, %v2753_v25  ;;  %v825_v42 = vrot.slane %v815_v36, 4  ;;  %v750_v36 = vpop.f32.mrf.mxu1 }
 0x161   : > { %v1123_v43 = vsel %vm764_vm1, %v1122_v24, %v1103_v31  ;;  %v813_v45 = vsel %vm764_vm1, 0.0, %v812_v29  ;;  %v837_v46 = vsel %vm764_vm1, %v836_v39, %v817_v40  ;;  %v1121_v48 = vperm.slane %v1117_v33, %v2753_v25 }
 0x162   : > { %v856_v47 = vrot.slane %v835_v38, 4  ;;  %v1110_v49 = vperm.slane %v1106_v23, %v2753_v25  ;;  %v826_v50 = vsel %vm764_vm1, %v825_v42, %v813_v45  ;;  %v841_v51 = vperm.slane %v837_v46, %v2753_v25 }
 0x163   : > { %v844_v52 = vrot.slane %v824_v41, 4  ;;  %v830_v53 = vperm.slane %v826_v50, %v2753_v25  ;;  %v1112_v54 = vsel %vm764_vm1, %v1111_v28, %v1099_v32  ;;  %v1127_v55 = vperm.slane %v1123_v43, %v2753_v25  ;;  %v2120_v50 = vld [vmem:[%s3052_s8] ss:$0 sm:$0xff] }
 0x164   : > { %v854_v56 = vrot.slane %v841_v51, 4  ;;  %v857_v57 = vsel %vm764_vm1, %v841_v51, %v856_v47  ;;  %v1142_v61 = vrot.slane %v1121_v48, 4  ;;  %v1116_v0 = vperm.slane %v1112_v54, %v2753_v25 }
 0x165   : > { %v842_v58 = vrot.slane %v830_v53, 4  ;;  %v845_v59 = vsel %vm764_vm1, %v830_v53, %v844_v52  ;;  %v865_v60 = vperm.slane %v857_v57, %v2765_v44  ;;  %v1130_v1 = vrot.slane %v1110_v49, 4 }
 0x166   : > { %v853_v62 = vperm.slane %v845_v59, %v2765_v44  ;;  %v855_v63 = vsel %vm764_vm1, %v854_v56, %v835_v38  ;;  %v1140_v5 = vrot.slane %v1127_v55, 4  ;;  %v1143_v10 = vsel %vm764_vm1, %v1127_v55, %v1142_v61 }
 0x167   : > { %v843_v2 = vsel %vm764_vm1, %v842_v58, %v824_v41  ;;  %v861_v3 = vperm.slane %v855_v63, %v2765_v44  ;;  %v870_v4 = vrot.slane %v865_v60, 4  ;;  %v1131_v13 = vsel %vm764_vm1, %v1116_v0, %v1130_v1 }
 0x168   : > { %v849_v6 = vperm.slane %v843_v2, %v2765_v44  ;;  %v872_v7 = vrot.slane %v853_v62, 4  ;;  %v1141_v15 = vsel %vm764_vm1, %v1140_v5, %v1121_v48  ;;  %v1151_v17 = vperm.slane %v1143_v10, %v2765_v44 }
 0x169   : > { %v866_v8 = vrot.slane %v861_v3, 4  ;;  %v871_v9 = vsel %vm764_vm1, %v870_v4, %v853_v62  ;;  %v1139_v18 = vperm.slane %v1131_v13, %v2765_v44  ;;  %v1128_v19 = vrot.slane %v1116_v0, 4 }
 0x16a   : > { %v868_v11 = vrot.slane %v849_v6, 4  ;;  %v873_v12 = vsel %vm764_vm1, %v865_v60, %v872_v7  ;;  %879 = vst.msk [vmem:[#allocation2 + $0x10] sm:$0xff] %vm876_vm2, %v871_v9  ;;  %v1147_v20 = vperm.slane %v1141_v15, %v2765_v44  ;;  %v1156_v21 = vrot.slane %v1151_v17, 4 }
 0x16b   : > { %v867_v14 = vsel %vm764_vm1, %v866_v8, %v849_v6  ;;  %880 = vst.msk [vmem:[#allocation2 + $0x18] sm:$0xff] %vm876_vm2, %v873_v12  ;;  %v1129_v23 = vsel %vm764_vm1, %v1128_v19, %v1110_v49  ;;  %v1158_v24 = vrot.slane %v1139_v18, 4  ;;  %v751_v51 = vadd.f32 %v2120_v50, %v750_v36 }
 0x16c   : > { %v869_v16 = vsel %vm764_vm1, %v861_v3, %v868_v11  ;;  %877 = vst.msk [vmem:[#allocation2] sm:$0xff] %vm876_vm2, %v867_v14  ;;  %v1152_v27 = vrot.slane %v1147_v20, 4  ;;  %v1157_v29 = vsel %vm764_vm1, %v1156_v21, %v1139_v18  ;;  %v1135_v31 = vperm.slane %v1129_v23, %v2765_v44 }
 0x16d   : > { %878 = vst.msk [vmem:[#allocation2 + $0x8] sm:$0xff] %vm876_vm2, %v869_v16  ;;  %v1159_v32 = vsel %vm764_vm1, %v1151_v17, %v1158_v24  ;;  %v893_v15 = vrot.slane %v751_v51, 4 }
 0x16e   : > { %v1153_v33 = vsel %vm764_vm1, %v1152_v27, %v1135_v31  ;;  %v1154_v34 = vrot.slane %v1135_v31, 4 }
 0x170   : > { %v1155_v35 = vsel %vm764_vm1, %v1147_v20, %v1154_v34 }
 0x171   : > { %v1164_v22 = vld [vmem:[#allocation2 + $0x10] sm:$0xff] }
 0x172   : > { %1972 = vmatpush.xpose.msk.msrb.mxu0 %vm876_vm2, %v1164_v22  ;;  %v1165_v26 = vld [vmem:[#allocation2 + $0x18] sm:$0xff] }
 0x173   : > { %v1162_v28 = vld [vmem:[#allocation2] sm:$0xff]  ;;  %1974 = vmatpush.xpose.msk.msrb.mxu1 %vm876_vm2, %v1165_v26 }
 0x174   : > { %1968 = vmatpush.xpose.msk.msra.mxu3 %vm876_vm2, %v1162_v28  ;;  %v1163_v30 = vld [vmem:[#allocation2 + $0x8] sm:$0xff] }
 0x175   : > { %1973 = vmatmul.msk.f32.vlgmr.msrb.gmra.mxu0 %vm876_vm2, %v1157_v29 }
 0x176   : > { %1975 = vmatmul.msk.f32.vlgmr.msrb.gmra.mxu1 %vm876_vm2, %v1159_v32 }
 0x177   : > { %1969 = vmatmul.msk.f32.vlgmr.msra.gmra.mxu3 %vm876_vm2, %v1153_v33 }
 0x178   : > { %1970 = vmatpush.xpose.msk.msrb.mxu3 %vm876_vm2, %v1163_v30 }
 0x17f   : > { %1971 = vmatmul.msk.f32.vlgmr.msrb.gmra.mxu3 %vm876_vm2, %v1155_v35 }
 0x1f2   : > { %v1247_v37 = vpop.f32.mrf.mxu0 }
 0x1f3   : > { %v1278_v38 = vmul.f32 0.35355338, %v1247_v37  ;;  %v1273_v40 = vpop.f32.mrf.mxu1 }
 0x1f4   : > { %v1279_v41 = vmul.f32 0.35355338, %v1273_v40 }
 0x1f5   : > { %v1286_v39 = vsel %vm876_vm2, %v1278_v38, -inf }
 0x1f6   : > { %1287 = vmax.xlane.f32.xlu2 %v1286_v39  ;;  %v1289_v45 = vsel %vm876_vm2, %v1279_v41, -inf }
 0x1fa   : > { %v1195_v42 = vpop.f32.mrf.mxu3 }
 0x1fb   : > { %v1276_v43 = vmul.f32 0.35355338, %v1195_v42 }
 0x1fd   : > { %v1280_v46 = vsel %vm876_vm2, %v1276_v43, -inf }
 0x1fe   : > { %1290 = vmax.xlane.f32.xlu2 %v1289_v45  ;;  %1281 = vmax.xlane.f32.xlu0 %v1280_v46 }
 0x202   : > { %v1221_v47 = vpop.f32.mrf.mxu3 }
 0x203   : > { %v1277_v48 = vmul.f32 0.35355338, %v1221_v47 }
 0x205   : > { %v1283_v49 = vsel %vm876_vm2, %v1277_v48, -inf }
 0x206   : > { %1284 = vmax.xlane.f32.xlu1 %v1283_v49 }
 0x212   : > { %882 = vrot.lane.b32.xlu0 %v751_v51, %s2483_s20 }
 0x216   : > { %888 = vrot.lane.b32.xlu2 %v751_v51, %s2482_s15  ;;  %s2364_s15 = scalar_lea.hbm %s2363_s19, 32 }
 0x217   : > { %p2365_p1 = scmp.ne.s32.totalorder %s2363_s19, %s2364_s15  ;;  %p2370_p11 = scmp.lt.s32.totalorder %s2368_s10, %s2364_s15 }
 0x219   : > { %p2366_p3 = pnand %p2365_p1, %p2644_p2  ;;  %p2371_p12 = por %p2370_p11, %p2369_p10 }
 0x21b   : > { %p2367_p5 = pneg %p2366_p3 }
 0x21d   : > { %p2372_p13 = pnand %p2371_p12, %p2367_p5 }
 0x21f   : > { %885 = vrot.lane.b32.xlu1 %v751_v51, %s2484_s26 }
 0x269   : > { %v1288_v52 = vpop.xlane.xlu2 %1287 }
 0x26a   : > { %v1294_v53 = vsub.f32 %v1278_v38, %v1288_v52 }
 0x26c   : > { %v1300_v54 = vmul.f32 1.442695, %v1294_v53 }
 0x26e   : > { %2122 = vpow2.f32 %v1300_v54 }
 0x271   : > { %v1282_v55 = vpop.xlane.xlu0 %1281  ;;  %v1291_v56 = vpop.xlane.xlu2 %1290 }
 0x272   : > { %v1292_v57 = vsub.f32 %v1276_v43, %v1282_v55  ;;  %v1295_v60 = vsub.f32 %v1279_v41, %v1291_v56 }
 0x274   : > { %v2862_v58 = vpop.eup %2122  ;;  %v1296_v59 = vmul.f32 1.442695, %v1292_v57  ;;  %v1302_v62 = vmul.f32 1.442695, %v1295_v60 }
 0x275   : > { %v1310_v61 = vsel %vm876_vm2, %v2862_v58, 0.0 }
 0x276   : > { %1311 = vadd.xlane.f32.xlu2 %v1310_v61  ;;  %2124 = vpow2.f32 %v1296_v59 }
 0x277   : > { %2126 = vpow2.f32 %v1302_v62 }
 0x279   : > { %v1285_v63 = vpop.xlane.xlu1 %1284  ;;  %v889_v10 = vpop.permute.xlu2 %888 }
 0x27a   : > { %v1293_v0 = vsub.f32 %v1277_v48, %v1285_v63  ;;  %v903_v11 = vrot.slane %v889_v10, 4 }
 0x27c   : > { %v1298_v1 = vmul.f32 1.442695, %v1293_v0  ;;  %v2866_v2 = vpop.eup %2124 }
 0x27d   : > { %v1304_v3 = vsel %vm876_vm2, %v2866_v2, 0.0  ;;  %v2870_v4 = vpop.eup %2126 }
 0x27e   : > { %2128 = vpow2.f32 %v1298_v1  ;;  %1305 = vadd.xlane.f32.xlu0 %v1304_v3  ;;  %v1313_v8 = vsel %vm876_vm2, %v2870_v4, 0.0 }
 0x284   : > { %v2872_v5 = vpop.eup %2128  ;;  %v883_v6 = vpop.permute.xlu0 %882 }
 0x285   : > { %v1307_v7 = vsel %vm876_vm2, %v2872_v5, 0.0  ;;  %v905_v9 = vrot.slane %v883_v6, 4  ;;  %v904_v13 = vsel %vm764_vm1, %v903_v11, %v883_v6 }
 0x286   : > { %1308 = vadd.xlane.f32.xlu1 %v1307_v7  ;;  %1314 = vadd.xlane.f32.xlu0 %v1313_v8  ;;  %v910_v16 = vperm.slane %v904_v13, %v2753_v25 }
 0x287   : > { %v906_v12 = vsel %vm764_vm1, %v889_v10, %v905_v9 }
 0x288   : > { %v914_v14 = vperm.slane %v906_v12, %v2753_v25  ;;  %v915_v23 = vrot.slane %v910_v16, 4 }
 0x28a   : > { %v927_v20 = vrot.slane %v914_v14, 4 }
 0x291   : > { %v886_v17 = vpop.permute.xlu1 %885 }
 0x292   : > { %v891_v18 = vrot.slane %v886_v17, 4  ;;  %v894_v19 = vsel %vm764_vm1, %v886_v17, %v893_v15 }
 0x293   : > { %v902_v21 = vperm.slane %v894_v19, %v2753_v25 }
 0x294   : > { %v892_v22 = vsel %vm764_vm1, %v891_v18, %v751_v51 }
 0x295   : > { %v898_v24 = vperm.slane %v892_v22, %v2753_v25  ;;  %v928_v26 = vsel %vm764_vm1, %v927_v20, %v902_v21  ;;  %v929_v27 = vrot.slane %v902_v21, 4 }
 0x296   : > { %v934_v28 = vperm.slane %v928_v26, %v2765_v44 }
 0x297   : > { %v916_v29 = vsel %vm764_vm1, %v915_v23, %v898_v24  ;;  %v917_v30 = vrot.slane %v898_v24, 4  ;;  %v930_v31 = vsel %vm764_vm1, %v914_v14, %v929_v27 }
 0x298   : > { %v922_v32 = vperm.slane %v916_v29, %v2765_v44  ;;  %v938_v33 = vperm.slane %v930_v31, %v2765_v44  ;;  %v943_v36 = vrot.slane %v934_v28, 4 }
 0x299   : > { %v918_v34 = vsel %vm764_vm1, %v910_v16, %v917_v30 }
 0x29a   : > { %v926_v35 = vperm.slane %v918_v34, %v2765_v44  ;;  %v945_v37 = vrot.slane %v938_v33, 4  ;;  %v939_v38 = vrot.slane %v922_v32, 4  ;;  %v944_v46 = vsel %vm764_vm1, 0.0, %v943_v36 }
 0x29c   : > { %v941_v39 = vrot.slane %v926_v35, 4  ;;  %v946_v40 = vsel %vm764_vm1, 0.0, %v945_v37  ;;  %v958_v41 = vsel %vm764_vm1, %v945_v37, %v934_v28  ;;  %v940_v52 = vsel %vm764_vm1, 0.0, %v939_v38 }
 0x29d   : > { %v962_v42 = vperm.slane %v958_v41, %v2753_v25  ;;  %v963_v43 = vrot.slane %v946_v40, 4 }
 0x29e   : > { %v942_v45 = vsel %vm764_vm1, 0.0, %v941_v39  ;;  %v947_v47 = vsel %vm764_vm1, %v941_v39, %v922_v32 }
 0x29f   : > { %v951_v48 = vperm.slane %v947_v47, %v2753_v25  ;;  %v952_v49 = vrot.slane %v942_v45, 4  ;;  %v964_v50 = vsel %vm764_vm1, %v963_v43, %v944_v46  ;;  %v983_v51 = vrot.slane %v962_v42, 4 }
 0x2a0   : > { %v968_v53 = vperm.slane %v964_v50, %v2753_v25 }
 0x2a1   : > { %v953_v54 = vsel %vm764_vm1, %v952_v49, %v940_v52  ;;  %v971_v55 = vrot.slane %v951_v48, 4 }
 0x2a2   : > { %v957_v56 = vperm.slane %v953_v54, %v2753_v25  ;;  %v981_v57 = vrot.slane %v968_v53, 4  ;;  %v984_v59 = vsel %vm764_vm1, %v968_v53, %v983_v51 }
 0x2a3   : > { %v992_v60 = vperm.slane %v984_v59, %v2765_v44 }
 0x2a4   : > { %v969_v61 = vrot.slane %v957_v56, 4  ;;  %v972_v62 = vsel %vm764_vm1, %v957_v56, %v971_v55  ;;  %v982_v63 = vsel %vm764_vm1, %v981_v57, %v962_v42 }
 0x2a5   : > { %v980_v0 = vperm.slane %v972_v62, %v2765_v44  ;;  %v988_v1 = vperm.slane %v982_v63, %v2765_v44  ;;  %v997_v3 = vrot.slane %v992_v60, 4 }
 0x2a6   : > { %v970_v6 = vsel %vm764_vm1, %v969_v61, %v951_v48 }
 0x2a7   : > { %v976_v7 = vperm.slane %v970_v6, %v2765_v44  ;;  %v993_v8 = vrot.slane %v988_v1, 4  ;;  %v998_v9 = vsel %vm764_vm1, %v997_v3, %v980_v0  ;;  %v999_v10 = vrot.slane %v980_v0, 4 }
 0x2a8   : > { %1004 = vst.msk [vmem:[#allocation3 + $0x10] sm:$0xff] %vm876_vm2, %v998_v9 }
 0x2a9   : > { %v994_v11 = vsel %vm764_vm1, %v993_v8, %v976_v7  ;;  %v995_v12 = vrot.slane %v976_v7, 4  ;;  %v1000_v13 = vsel %vm764_vm1, %v992_v60, %v999_v10 }
 0x2aa   : > { %1002 = vst.msk [vmem:[#allocation3] sm:$0xff] %vm876_vm2, %v994_v11 }
 0x2ab   : > { %v996_v14 = vsel %vm764_vm1, %v988_v1, %v995_v12  ;;  %1005 = vst.msk [vmem:[#allocation3 + $0x18] sm:$0xff] %vm876_vm2, %v1000_v13 }
 0x2ac   : > { %1003 = vst.msk [vmem:[#allocation3 + $0x8] sm:$0xff] %vm876_vm2, %v996_v14 }
 0x2af   : > { %v1169_v15 = vld [vmem:[#allocation3 + $0x10] sm:$0xff] }
 0x2b0   : > { %1444 = vmatpush.msra.mxu0 %v1169_v15 }
 0x2b1   : > { %v1167_v16 = vld [vmem:[#allocation3] sm:$0xff] }
 0x2b2   : > { %1398 = vmatpush.msrb.mxu2 %v1167_v16  ;;  %v1170_v17 = vld [vmem:[#allocation3 + $0x18] sm:$0xff] }
 0x2b3   : > { %1467 = vmatpush.msra.mxu1 %v1170_v17  ;;  %v1168_v18 = vld [vmem:[#allocation3 + $0x8] sm:$0xff] }
 0x2b4   : > { %1421 = vmatpush.msra.mxu3 %v1168_v18 }
 0x2e9   : > { %v1312_v19 = vpop.xlane.xlu2 %1311 }
 0x2ea   : > { %2130 = vrcp.f32 %v1312_v19  ;;  %v1355_v24 = vand.u32 2147483648, %v1312_v19  ;;  %v1353_v27 = vand.u32 2147483647, %v1312_v19  ;;  %vm1349_vm4 = vweird.f32 %v1312_v19 }
 0x2ec   : > { %v1356_v29 = vor.u32 1.1754944e-38, %v1355_v24  ;;  %vm1354_vm6 = vcmp.eq.f32.partialorder %v1353_v27, 8.507059e+37 }
 0x2f0   : > { %v2131_v20 = vpop.eup %2130 }
 0x2f1   : > { %v1345_v21 = vmul.f32 %v2131_v20, %v1312_v19  ;;  %v1306_v22 = vpop.xlane.xlu0 %1305  ;;  %vm1350_vm3 = vweird.f32 %v2131_v20 }
 0x2f2   : > { %2132 = vrcp.f32 %v1306_v22  ;;  %vm1351_vm5 = vmor %vm1349_vm4, %vm1350_vm3  ;;  %v1327_v37 = vand.u32 2147483648, %v1306_v22  ;;  %v1325_v40 = vand.u32 2147483647, %v1306_v22  ;;  %vm1321_vm8 = vweird.f32 %v1306_v22 }
 0x2f3   : > { %v1346_v23 = vsub.f32 1.0, %v1345_v21 }
 0x2f4   : > { %v1328_v45 = vor.u32 1.1754944e-38, %v1327_v37  ;;  %vm1326_vm10 = vcmp.eq.f32.partialorder %v1325_v40, 8.507059e+37 }
 0x2f5   : > { %v1347_v26 = vmul.f32 %v2131_v20, %v1346_v23 }
 0x2f7   : > { %v1348_v28 = vadd.f32 %v2131_v20, %v1347_v26 }
 0x2f8   : > { %v2133_v30 = vpop.eup %2132 }
 0x2f9   : > { %v1352_v31 = vsel %vm1351_vm5, %v2131_v20, %v1348_v28  ;;  %v1309_v32 = vpop.xlane.xlu1 %1308  ;;  %v1317_v34 = vmul.f32 %v2133_v30, %v1306_v22  ;;  %v1315_v35 = vpop.xlane.xlu0 %1314  ;;  %vm1322_vm7 = vweird.f32 %v2133_v30 }
 0x2fa   : > { %v1357_v33 = vsel %vm1354_vm6, %v1356_v29, %v1352_v31  ;;  %2134 = vrcp.f32 %v1309_v32  ;;  %vm1323_vm9 = vmor %vm1321_vm8, %vm1322_vm7  ;;  %v1341_v51 = vand.u32 2147483648, %v1309_v32  ;;  %v1369_v53 = vand.u32 2147483648, %v1315_v35 }
 0x2fb   : > { %2136 = vrcp.f32 %v1315_v35  ;;  %v1318_v36 = vsub.f32 1.0, %v1317_v34  ;;  %v1374_v38 = vmul.f32 %v2862_v58, %v1357_v33  ;;  %v1339_v55 = vand.u32 2147483647, %v1309_v32 }
 0x2fc   : > { %v1367_v57 = vand.u32 2147483647, %v1315_v35  ;;  %vm1335_vm13 = vweird.f32 %v1309_v32  ;;  %vm1363_vm14 = vweird.f32 %v1315_v35  ;;  %v1342_v61 = vor.u32 1.1754944e-38, %v1341_v51 }
 0x2fd   : > { %v1319_v39 = vmul.f32 %v2133_v30, %v1318_v36  ;;  %1378 = vst.msk [vmem:[%s2924_s14 + $0x10] sm:$0xff] %vm876_vm2, %v1374_v38  ;;  %1978 = vmatmul.msk.f32.vlgmr.msra.gmra.mxu0 %vm876_vm2, %v1374_v38  ;;  %vm1340_vm4 = vcmp.eq.f32.partialorder %v1339_v55, 8.507059e+37  ;;  %vm1595_vm6 = vcmask 130048   ;;  %vm1597_vm7 = vcmask 195584  }
 0x2fe   : > { %vm1368_vm5 = vcmp.eq.f32.partialorder %v1367_v57, 8.507059e+37 }
 0x2ff   : > { %v1320_v42 = vadd.f32 %v2133_v30, %v1319_v39 }
 0x300   : > { %v2135_v41 = vpop.eup %2134 }
 0x301   : > { %v2137_v43 = vpop.eup %2136  ;;  %v1331_v46 = vmul.f32 %v2135_v41, %v1309_v32  ;;  %v1324_v47 = vsel %vm1323_vm9, %v2133_v30, %v1320_v42  ;;  %vm1336_vm11 = vweird.f32 %v2135_v41 }
 0x302   : > { %v1359_v58 = vmul.f32 %v2137_v43, %v1315_v35  ;;  %v1329_v49 = vsel %vm1326_vm10, %v1328_v45, %v1324_v47  ;;  %vm1364_vm12 = vweird.f32 %v2137_v43  ;;  %vm1337_vm15 = vmor %vm1335_vm13, %vm1336_vm11 }
 0x303   : > { %v1332_v48 = vsub.f32 1.0, %v1331_v46  ;;  %v1372_v52 = vmul.f32 %v2866_v2, %v1329_v49  ;;  %vm1365_vm3 = vmor %vm1363_vm14, %vm1364_vm12  ;;  %v1370_v2 = vor.u32 1.1754944e-38, %v1369_v53 }
 0x304   : > { %v1360_v50 = vsub.f32 1.0, %v1359_v58 }
 0x305   : > { %v1333_v54 = vmul.f32 %v2135_v41, %v1332_v48  ;;  %1376 = vst.msk [vmem:[%s2924_s14] sm:$0xff] %vm876_vm2, %v1372_v52  ;;  %1976 = vmatmul.msk.f32.vlgmr.msrb.gmra.mxu2 %vm876_vm2, %v1372_v52 }
 0x306   : > { %v1361_v56 = vmul.f32 %v2137_v43, %v1360_v50 }
 0x307   : > { %v1334_v59 = vadd.f32 %v2135_v41, %v1333_v54 }
 0x308   : > { %v1362_v60 = vadd.f32 %v2137_v43, %v1361_v56 }
 0x309   : > { %v1338_v62 = vsel %vm1337_vm15, %v2135_v41, %v1334_v59 }
 0x30a   : > { %v1366_v63 = vsel %vm1365_vm3, %v2137_v43, %v1362_v60  ;;  %v1343_v0 = vsel %vm1340_vm4, %v1342_v61, %v1338_v62 }
 0x30b   : > { %v1371_v1 = vsel %vm1368_vm5, %v1370_v2, %v1366_v63  ;;  %v1373_v3 = vmul.f32 %v2872_v5, %v1343_v0 }
 0x30c   : > { %v1375_v6 = vmul.f32 %v2870_v4, %v1371_v1 }
 0x30d   : > { %1377 = vst.msk [vmem:[%s2924_s14 + $0x8] sm:$0xff] %vm876_vm2, %v1373_v3  ;;  %1977 = vmatmul.msk.f32.vlgmr.msra.gmra.mxu3 %vm876_vm2, %v1373_v3 }
 0x30e   : > { %1379 = vst.msk [vmem:[%s2924_s14 + $0x18] sm:$0xff] %vm876_vm2, %v1375_v6  ;;  %1979 = vmatmul.msk.f32.vlgmr.msra.gmra.mxu1 %vm876_vm2, %v1375_v6 }
 0x37a   : > { %v1446_v7 = vpop.f32.mrf.mxu0 }
 0x37b   : > { %v1472_v8 = vrot.slane %v1446_v7, 4 }
 0x388   : > { %v1400_v9 = vpop.f32.mrf.mxu2 }
 0x389   : > { %v1474_v10 = vrot.slane %v1400_v9, 4  ;;  %v1473_v11 = vsel %vm764_vm1, %v1472_v8, %v1400_v9 }
 0x38a   : > { %v1479_v5 = vperm.slane %v1473_v11, %v2753_v25  ;;  %v1601_v11 = vld [vmem:[#allocation15 + $0x10] sm:$0xff] }
 0x38b   : > { %v1469_v12 = vpop.f32.mrf.mxu1  ;;  %v1475_v13 = vsel %vm764_vm1, %v1446_v7, %v1474_v10  ;;  %v1602_v10 = vld [vmem:[#allocation15 + $0x18] sm:$0xff] }
 0x38c   : > { %v1484_v4 = vrot.slane %v1469_v12, 4  ;;  %v1483_v14 = vperm.slane %v1475_v13, %v2753_v25  ;;  %v1498_v18 = vrot.slane %v1479_v5, 4  ;;  %1618 = vmatpush.msra.mxu2 %v1602_v10 }
 0x38e   : > { %v1510_v21 = vrot.slane %v1483_v14, 4  ;;  %1619 = vmatpush.msra.mxu2 %v1601_v11 }
 0x390   : > { %v1423_v15 = vpop.f32.mrf.mxu3 }
 0x391   : > { %v1485_v16 = vsel %vm764_vm1, %v1484_v4, %v1423_v15  ;;  %v1486_v17 = vrot.slane %v1423_v15, 4 }
 0x392   : > { %v1491_v19 = vperm.slane %v1485_v16, %v2753_v25 }
 0x393   : > { %v1487_v20 = vsel %vm764_vm1, %v1469_v12, %v1486_v17  ;;  %v1599_v12 = vld [vmem:[#allocation15] sm:$0xff] }
 0x394   : > { %v1495_v22 = vperm.slane %v1487_v20, %v2753_v25  ;;  %v1496_v23 = vrot.slane %v1491_v19, 4  ;;  %v1499_v24 = vsel %vm764_vm1, %v1491_v19, %v1498_v18 }
 0x395   : > { %v1507_v26 = vperm.slane %v1499_v24, %v2765_v44 }
 0x396   : > { %v1497_v27 = vsel %vm764_vm1, %v1496_v23, %v1479_v5  ;;  %v1508_v28 = vrot.slane %v1495_v22, 4  ;;  %v1511_v29 = vsel %vm764_vm1, %v1495_v22, %v1510_v21 }
 0x397   : > { %v1503_v30 = vperm.slane %v1497_v27, %v2765_v44  ;;  %v1519_v31 = vperm.slane %v1511_v29, %v2765_v44  ;;  %v1522_v32 = vrot.slane %v1507_v26, 4 }
 0x398   : > { %v1509_v33 = vsel %vm764_vm1, %v1508_v28, %v1483_v14 }
 0x399   : > { %v1515_v34 = vperm.slane %v1509_v33, %v2765_v44  ;;  %v1520_v35 = vrot.slane %v1503_v30, 4  ;;  %v1523_v36 = vsel %vm764_vm1, 0.0, %v1522_v32  ;;  %v1526_v37 = vrot.slane %v1519_v31, 4 }
 0x39a   : > { %v1528_v38 = vsel %vm764_vm1, %v1522_v32, %v1503_v30  ;;  %v1533_v39 = vrot.slane %v1523_v36, 4 }
 0x39b   : > { %v1521_v40 = vsel %vm764_vm1, 0.0, %v1520_v35  ;;  %v1524_v41 = vrot.slane %v1515_v34, 4  ;;  %v1527_v42 = vsel %vm764_vm1, 0.0, %v1526_v37  ;;  %v1532_v43 = vperm.slane %v1528_v38, %v2753_v25 }
 0x39c   : > { %v1544_v45 = vrot.slane %v1527_v42, 4  ;;  %v1534_v46 = vsel %vm764_vm1, %v1533_v39, %v1521_v40  ;;  %v1539_v58 = vsel %vm764_vm1, %v1526_v37, %v1515_v34 }
 0x39d   : > { %v1525_v47 = vsel %vm764_vm1, 0.0, %v1524_v41  ;;  %v1538_v48 = vperm.slane %v1534_v46, %v2753_v25  ;;  %v1543_v49 = vperm.slane %v1539_v58, %v2753_v25  ;;  %v1552_v50 = vrot.slane %v1532_v43, 4 }
 0x39e   : > { %v1545_v51 = vsel %vm764_vm1, %v1544_v45, %v1525_v47 }
 0x39f   : > { %v1549_v52 = vperm.slane %v1545_v51, %v2753_v25  ;;  %v1553_v53 = vsel %vm764_vm1, %v1538_v48, %v1552_v50  ;;  %v1564_v54 = vrot.slane %v1543_v49, 4  ;;  %v1550_v55 = vrot.slane %v1538_v48, 4 }
 0x3a0   : > { %v1561_v56 = vperm.slane %v1553_v53, %v2765_v44 }
 0x3a1   : > { %v1565_v57 = vsel %vm764_vm1, %v1549_v52, %v1564_v54  ;;  %v1551_v59 = vsel %vm764_vm1, %v1550_v55, %v1532_v43  ;;  %v1562_v60 = vrot.slane %v1549_v52, 4 }
 0x3a2   : > { %v1573_v61 = vperm.slane %v1565_v57, %v2765_v44  ;;  %v1580_v2 = vrot.slane %v1561_v56, 4  ;;  %v1557_v62 = vperm.slane %v1551_v59, %v2765_v44 }
 0x3a3   : > { %v1563_v63 = vsel %vm764_vm1, %v1562_v60, %v1543_v49 }
 0x3a4   : > { %v1581_v25 = vsel %vm764_vm1, %v1573_v61, %v1580_v2  ;;  %v1578_v0 = vrot.slane %v1573_v61, 4  ;;  %v1569_v1 = vperm.slane %v1563_v63, %v2765_v44  ;;  %v1576_v3 = vrot.slane %v1557_v62, 4  ;;  %v1600_v44 = vld [vmem:[#allocation15 + $0x8] sm:$0xff] }
 0x3a5   : > { %1591 = vrot.lane.b32.xlu2 %v1581_v25, %s2487_s3  ;;  %1620 = vmatpush.msra.mxu2 %v1600_v44 }
 0x3a6   : > { %v1579_v6 = vsel %vm764_vm1, %v1578_v0, %v1561_v56  ;;  %v1574_v7 = vrot.slane %v1569_v1, 4  ;;  %v1577_v8 = vsel %vm764_vm1, %v1569_v1, %v1576_v3 }
 0x3a7   : > { %1587 = vrot.lane.b32.xlu0 %v1579_v6, %s2488_s25  ;;  %1583 = vrot.lane.b32.xlu1 %v1577_v8, %s2489_s30 }
 0x3a8   : > { %v1575_v9 = vsel %vm764_vm1, %v1574_v7, %v1557_v62  ;;  %1621 = vmatpush.msra.mxu2 %v1599_v12 }
 0x3ff   : > { %v1592_v14 = vpop.permute.xlu2 %1591 }
 0x419   : > { %v1588_v13 = vpop.permute.xlu0 %1587  ;;  %v1584_v5 = vpop.permute.xlu1 %1583 }
 0x41a   : > { %v1594_v4 = vsel %vm876_vm2, %v1575_v9, %v1584_v5 }
 0x41b   : > { %v1596_v15 = vsel %vm1595_vm6, %v1594_v4, %v1588_v13 }
 0x41c   : > { %v1598_v16 = vsel %vm1597_vm7, %v1596_v15, %v1592_v14 }
 0x41d   : > { %1980 = vmatmul.msk.f32.vlgmr.msra.gmra.mxu2 %vm697_vm0, %v1598_v16 }
 0x41e   : > { %2375 = shalt.err (!%p2372_p13)
}
 0x41f   : > { %s2490_s17 = smov 128   ;;  %s1983_s11 = sshll.u32 %s2466_s24, 3 }
 0x420   : > { %2012 = dma.vmem_to_hbm [thread:$0]  (%p2644_p2), %s1680_s13, 512, %s1682_s18, %s1649_s27, %s2490_s17, %s2490_s17, %s2489_s30  }
 0x421   : > { %s3102_s25 = sld [smem:[#allocation38_spill]]  ;;  %s665_s15 = scalar_lea.vmem [#allocation16], %s2716_s5 }
 0x422   : > { %s3104_s19 = sld [smem:[#allocation37_spill]]  ;;  %s1662_s20 = sshll.u32 %s665_s15, 4  ;;  %s1663_s20 = int_to_ptr.vmem [resolvable:$true] %s1662_s20 }
 0x423   : > { %s1644_s30 = scalar_lea.sflag [#allocation6], %s2713_s21 }
 0x427   : > { %s3103_s16 = smov %s3102_s25  ;;  %s1660_s7 = scalar_lea.hbm %s3102_s25, %s1983_s11 }
 0x428   : > { %v2121_v17 = vld [vmem:[%s3104_s19] ss:$0 sm:$0xff]  ;;  %s1664_s28 = sshll.u32 %s1660_s7, 4  ;;  %s2396_s5 = scalar_lea.hbm %s3103_s16, 16  ;;  %s1665_s28 = int_to_ptr.hbm [resolvable:$true] %s1664_s28 }
 0x429   : > { %s2390_s24 = sshra.s32 %s1665_s28, 4  ;;  %s2391_s24 = int_to_ptr.hbm [resolvable:$true] %s2390_s24 }
 0x42a   : > { %s2392_s13 = scalar_lea.hbm %s2391_s24, 8  ;;  %p2397_p8 = scmp.lt.s32.totalorder %s2391_s24, %s3103_s16 }
 0x42b   : > { %p2393_p0 = scmp.ne.s32.totalorder %s2391_s24, %s2392_s13  ;;  %p2398_p1 = scmp.lt.s32.totalorder %s2396_s5, %s2392_s13 }
 0x42d   : > { %p2394_p4 = pnand %p2393_p0, %p2644_p2  ;;  %p2399_p3 = por %p2398_p1, %p2397_p8 }
 0x42f   : > { %p2395_p9 = pneg %p2394_p4 }
 0x431   : > { %p2400_p5 = pnand %p2399_p3, %p2395_p9 }
 0x4a0   : > { %v1623_v18 = vpop.f32.mrf.mxu2 }
 0x4a1   : > { %v1634_v19 = vadd.f32 %v2121_v17, %v1623_v18 }
 0x4a3   : > { %1635 = vst.msk [vmem:[%s665_s15] sm:$0xff] %vm697_vm0, %v1634_v19 }
 0x4a4   : > { %2403 = shalt.err (!%p2400_p5)
}
 0x4a5   : > { %2011 = dma.vmem_to_hbm [thread:$0]  (%p2644_p2), %s1663_s20, 128, %s1665_s28, %s1644_s30  }
 0x4a6 PF: > { %s3105_s21 = sld [smem:[#allocation25_spill]]  ;;  %p2039_p10 = pnand %p1948_p6, %p2651_p7 }
 0x4a7   : > { %s3107_s17 = sld [smem:[#allocation27_spill]] }
 0x4a8   : > { %p2040_p11 = pneg %p2039_p10 }
 0x4ac   : > { %s1696_s11 = sand.u32 1, %s3105_s21  }
 0x4ad   : > { %s1697_s14 = scalar_lea.sflag [#allocation6], %s1696_s11 }
 0x4ae   : > { %2445 = dma.done.wait (%p2040_p11), %s1697_s14, 128  }
 0x4af   : > { %2447 = vsyncadd (%p2040_p11), %s1697_s14, 4294967168  ;;  %s1707_s3 = scalar_lea.sflag [#allocation18], %s1696_s11 }
 0x4b0   : > { %2449 = dma.done.wait (%p2040_p11), %s1707_s3, 512  }
 0x4b1   : > { %2451 = vsyncadd (%p2040_p11), %s1707_s3, 4294966784  ;;  %s37_s26 = sadd.s32 1, %s3107_s17   ;;  %s3108_s29 = sld [smem:[#allocation29_spill]] }
 0x4b2   : > { %p34_p12 = scmp.ge.s32.totalorder %s37_s26, 4   ;;  %s3109_s24 = sld [smem:[#allocation26_spill]] }
 0x4b3   : > { %s3110_s25 = sld [smem:[#allocation28_spill]]  ;;  %s3111_s21 = smov %s2458_s22 }
 0x4b4   : > { %s3112_s22 = smov %s2462_s23  ;;  %36 = sbr.rel (!%p34_p12) target bundleno = 22 (0x16), region = 195 }
 0x4b7   : > { %s3113_s23 = smov %s3108_s29 }
 0x4b9   :  { %1713 = vsyncpa [#allocation5], 1 }
 0x4ba   :  { %1715 = vsyncpa [#allocation5 + $0x1], 1 }
 0x4bb   :  { %1716 = vsyncpa [#allocation8], 1 }
 0x4bc   :  { %1718 = vsyncpa [#allocation8 + $0x1], 1 }
 0x4bd   :  { %1719 = vsyncpa [#allocation11], 1 }
 0x4be   :  { %1720 = vsyncpa [#allocation14], 1 }
 0x4bf   :  { %1721 = vsyncpa [#allocation6], 1 }
 0x4c0   :  { %1723 = vsyncpa [#allocation6 + $0x1], 1 }
 0x4c1   :  { %1724 = vsyncpa [#allocation18], 1 }
 0x4c2   :  { %1726 = vsyncpa [#allocation18 + $0x1], 1 }

</bundles_post_ra>
